<compile_context>
chip_gen: v5e
topology: v5e:2x2
jax: 0.10.0
libtpu: 0.0.40
codegen_flags: <defaults>
</compile_context>

<pallas_src>
import math
from functools import partial

import jax
import jax.numpy as jnp
from jax.experimental import pallas as pl
from jax.experimental.pallas import tpu as pltpu

# Align kernel-side and reference-side f32 matmul numerics.
jax.config.update("jax_default_matmul_precision", "highest")

# ----------------------------- config (mirrors the PyTorch `config`) ----------
N_EMBD = 3
N_HEAD = 3
LN_EPS = 1e-5

_PARAM_ORDER = ("ln1_g", "ln1_b", "w_qkv", "b_qkv", "w_ap", "b_ap",
                "ln2_g", "ln2_b", "w_fc", "b_fc", "w_mp", "b_mp")


def _param_layout(C):
    """Static (row_offset, rows, cols) of each parameter inside the slab."""
    shapes = {
        "ln1_g": (1, C), "ln1_b": (1, C),
        "w_qkv": (C, 3 * C), "b_qkv": (1, 3 * C),
        "w_ap": (C, C), "b_ap": (1, C),
        "ln2_g": (1, C), "ln2_b": (1, C),
        "w_fc": (C, 4 * C), "b_fc": (1, 4 * C),
        "w_mp": (4 * C, C), "b_mp": (1, C),
    }
    layout, off = {}, 0
    for name in _PARAM_ORDER:
        r, c = shapes[name]
        layout[name] = (off, r, c)
        off += r
    rows = ((off + 7) // 8) * 8            # sublane-align the slab
    return layout, rows


def pack_params(params, C, lanes=128):
    """Concatenate the 12 parameter arrays into one (8,128)-aligned f32 slab."""
    layout, rows = _param_layout(C)
    slab = jnp.zeros((rows, lanes), jnp.float32)
    for name, p in zip(_PARAM_ORDER, params):
        r0, nr, nc = layout[name]
        slab = slab.at[r0:r0 + nr, :nc].set(
            jnp.asarray(p, jnp.float32).reshape(nr, nc))
    return slab


# ----------------------------- math helpers (trace inside the kernel) ---------
def _layernorm(v, g, b):
    mu = jnp.mean(v, axis=-1, keepdims=True)
    var = jnp.mean((v - mu) ** 2, axis=-1, keepdims=True)
    return (v - mu) * jax.lax.rsqrt(var + LN_EPS) * g + b


def _erf(x):
    # Abramowitz & Stegun 7.1.26 (exp-only, max abs err 1.5e-7).  Keeps the
    # exact-erf nn.GELU() semantics without relying on a lax.erf lowering.
    a1, a2, a3, a4, a5 = (0.254829592, -0.284496736, 1.421413741,
                          -1.453152027, 1.061405429)
    p = 0.3275911
    ax = jnp.abs(x)
    t = 1.0 / (1.0 + p * ax)
    poly = ((((a5 * t + a4) * t + a3) * t + a2) * t + a1) * t
    y = 1.0 - poly * jnp.exp(-ax * ax)
    return jnp.where(x >= 0, y, -y)


def _gelu_exact(x):
    return 0.5 * x * (1.0 + _erf(x * (1.0 / math.sqrt(2.0))))


# ----------------------------- Pallas kernel ----------------------------------
def block_kernel(x_ref, p_ref, o_ref, *, n_head, batch):
    L, C = x_ref.shape                     # L = B*T
    B = batch
    T = L // B
    hd = C // n_head
    scale = 1.0 / math.sqrt(hd)

    layout, _ = _param_layout(C)

    def param(name):
        r0, nr, nc = layout[name]
        return p_ref[r0:r0 + nr, 0:nc]     # static ref slice: free

    def linear(v, wname, bname):
        # Tiny (K <= 12) contractions: one MXU dot per projection; push/pop
        # latency hides behind the VPU/EUP work and this avoids the per-k
        # lane-slice broadcasts (XLU) of the previous version.
        return (jnp.dot(v, param(wname), preferred_element_type=jnp.float32)
                + param(bname))

    x = x_ref[...].astype(jnp.float32)     # (L, C)

    # ---- attention branch: x = x + c_proj(attn(ln_1(x))) ----
    h = _layernorm(x, param("ln1_g"), param("ln1_b"))
    qkv = linear(h, "w_qkv", "b_qkv")      # (L, 3C)
    q, k, v = qkv[:, 0:C], qkv[:, C:2 * C], qkv[:, 2 * C:3 * C]

    # Causal mask built directly in its 4-D broadcast shape (no mask reshape).
    row = jax.lax.broadcasted_iota(jnp.int32, (1, T, T, 1), 1)
    col = jax.lax.broadcasted_iota(jnp.int32, (1, T, T, 1), 2)
    causal = col <= row                    # (1, T, T, 1)

    if hd == 1:
        # head_dim == 1: heads live on the lane axis, attention is pure VPU
        # broadcast-multiply + sublane reductions (no tiny per-head matmuls).
        q3 = q.reshape(B, T, C)
        k3 = k.reshape(B, T, C)
        v3 = v.reshape(B, T, C)
        att = q3[:, :, None, :] * k3[:, None, :, :] * scale   # (B,T,T,H)
        att = jnp.where(causal, att, -1e9)                    # masked_fill(-1e9)
        m = jnp.max(att, axis=2, keepdims=True)
        p = jnp.exp(att - m)
        att = p / jnp.sum(p, axis=2, keepdims=True)           # exact softmax
        y = jnp.sum(att * v3[:, None, :, :], axis=2)          # (B, T, C)
    else:
        # General head_dim fallback (not traced for this config: hd == 1).
        q4 = q.reshape(B, T, n_head, hd)
        k4 = k.reshape(B, T, n_head, hd)
        v4 = v.reshape(B, T, n_head, hd)
        att = jnp.einsum("bthd,bshd->btsh", q4, k4,
                         preferred_element_type=jnp.float32) * scale
        att = jnp.where(causal, att, -1e9)
        m = jnp.max(att, axis=2, keepdims=True)
        p = jnp.exp(att - m)
        att = p / jnp.sum(p, axis=2, keepdims=True)
        y = jnp.einsum("btsh,bshd->bthd", att, v4,
                       preferred_element_type=jnp.float32).reshape(B, T, C)

    x = x + linear(y.reshape(L, C), "w_ap", "b_ap")

    # ---- MLP branch: x = x + c_proj(gelu(c_fc(ln_2(x)))) ----
    h2 = _layernorm(x, param("ln2_g"), param("ln2_b"))
    h2 = _gelu_exact(linear(h2, "w_fc", "b_fc"))
    x = x + linear(h2, "w_mp", "b_mp")

    # Lane-dense store: output last dim is B*T (scales with batch), not C=3.
    o_ref[...] = x.T.astype(o_ref.dtype)


# ----------------------------- wrapper -----------------------------------------
def block_forward(x, param_slab):
    B, T, C = x.shape
    L = B * T
    vmem = pltpu.MemorySpace.VMEM
    out_t = pl.pallas_call(
        partial(block_kernel, n_head=N_HEAD, batch=B),
        out_shape=jax.ShapeDtypeStruct((C, L), x.dtype),
        in_specs=[pl.BlockSpec(memory_space=vmem),      # x, flattened (B*T, C)
                  pl.BlockSpec(memory_space=vmem)],     # packed parameter slab
        out_specs=pl.BlockSpec(memory_space=vmem),
    )(x.reshape(L, C), param_slab)
    return out_t.T.reshape(B, T, C)


# ----------------------------- pure-JAX reference -------------------------------
def block_reference(x, params):
    (ln1_g, ln1_b, w_qkv, b_qkv, w_ap, b_ap,
     ln2_g, ln2_b, w_fc, b_fc, w_mp, b_mp) = params
    B, T, C = x.shape
    hd = C // N_HEAD

    h = _layernorm(x, ln1_g, ln1_b)
    qkv = h @ w_qkv + b_qkv
    q, k, v = qkv[..., :C], qkv[..., C:2 * C], qkv[..., 2 * C:]
    q = q.reshape(B, T, N_HEAD, hd).transpose(0, 2, 1, 3)
    k = k.reshape(B, T, N_HEAD, hd).transpose(0, 2, 1, 3)
    v = v.reshape(B, T, N_HEAD, hd).transpose(0, 2, 1, 3)
    att = jnp.einsum("bhqd,bhkd->bhqk", q, k) / math.sqrt(hd)
    mask = jnp.tril(jnp.ones((T, T), dtype=bool))
    att = jnp.where(mask[None, None], att, -1e9)
    att = jax.nn.softmax(att, axis=-1)
    y = jnp.einsum("bhqk,bhkd->bhqd", att, v).transpose(0, 2, 1, 3).reshape(B, T, C)
    x = x + (y @ w_ap + b_ap)

    h2 = _layernorm(x, ln2_g, ln2_b)
    h2 = jax.nn.gelu(h2 @ w_fc + b_fc, approximate=False)
    x = x + (h2 @ w_mp + b_mp)
    return x


# ----------------------------- param init ---------------------------------------
def init_params(key, n_embd):
    C = n_embd
    ks = jax.random.split(key, 6)
    scale = 0.2
    # Weights stored as (in_features, out_features), biases as (1, out).
    ln1_g = jnp.ones((1, C), jnp.float32)
    ln1_b = jnp.zeros((1, C), jnp.float32)
    w_qkv = scale * jax.random.normal(ks[0], (C, 3 * C), jnp.float32)
    b_qkv = scale * jax.random.normal(ks[1], (1, 3 * C), jnp.float32)
    w_ap = scale * jax.random.normal(ks[2], (C, C), jnp.float32)
    b_ap = scale * jax.random.normal(ks[3], (1, C), jnp.float32)
    ln2_g = jnp.ones((1, C), jnp.float32)
    ln2_b = jnp.zeros((1, C), jnp.float32)
    w_fc = scale * jax.random.normal(ks[4], (C, 4 * C), jnp.float32)
    b_fc = jnp.zeros((1, 4 * C), jnp.float32)
    w_mp = scale * jax.random.normal(ks[5], (4 * C, C), jnp.float32)
    b_mp = jnp.zeros((1, C), jnp.float32)
    return (ln1_g, ln1_b, w_qkv, b_qkv, w_ap, b_ap,
            ln2_g, ln2_b, w_fc, b_fc, w_mp, b_mp)


if __name__ == "__main__":
    key = jax.random.PRNGKey(0)
    k_x, k_p = jax.random.split(key)

    B, T, C = 2, 8, N_EMBD                 # T <= block_size (40)
    x = jax.random.normal(k_x, (B, T, C), jnp.float32)
    params = init_params(k_p, N_EMBD)
    slab = pack_params(params, N_EMBD)     # single (32, 128) parameter DMA

    out = jax.block_until_ready(block_forward(x, slab))
    ref = block_reference(x, params)

    assert out.shape == (B, T, C)
    max_err = jnp.max(jnp.abs(out - ref))
    assert jnp.allclose(out, ref, atol=2e-3, rtol=2e-3), f"max err {max_err}"
    print("KERNEL_OK")
</pallas_src>

<mosaic_0001>
module attributes {stable_mosaic.version = 11 : i64} {
  func.func @block_kernel(%arg0: memref<16x3xf32, #tpu.memory_space<vmem>>, %arg1: memref<32x128xf32, #tpu.memory_space<vmem>>, %arg2: memref<3x16xf32, #tpu.memory_space<vmem>>) attributes {dimension_semantics = [], scalar_prefetch = 0 : i64, scratch_operands = 0 : i64, tpu.core_type = #tpu.core_type<tc>} {
    %c0 = arith.constant 0 : index
    %c0_0 = arith.constant 0 : index
    %0 = vector.load %arg0[%c0, %c0_0] : memref<16x3xf32, #tpu.memory_space<vmem>>, vector<16x3xf32>
    %c0_1 = arith.constant 0 : index
    %c0_2 = arith.constant 0 : index
    %1 = vector.load %arg1[%c0_1, %c0_2] : memref<32x128xf32, #tpu.memory_space<vmem>>, vector<1x3xf32>
    %c1 = arith.constant 1 : index
    %c0_3 = arith.constant 0 : index
    %2 = vector.load %arg1[%c1, %c0_3] : memref<32x128xf32, #tpu.memory_space<vmem>>, vector<1x3xf32>
    %cst = arith.constant dense<0.000000e+00> : vector<16xf32>
    %3 = vector.multi_reduction <add>, %0, %cst [1] : vector<16x3xf32> to vector<16xf32>
    %4 = vector.shape_cast %3 : vector<16xf32> to vector<16x1xf32>
    %cst_4 = arith.constant 3.000000e+00 : f32
    %5 = vector.broadcast %cst_4 : f32 to vector<16x1xf32>
    %6 = arith.divf %4, %5 : vector<16x1xf32>
    %7 = vector.broadcast %6 : vector<16x1xf32> to vector<16x3xf32>
    %8 = arith.subf %0, %7 : vector<16x3xf32>
    %9 = arith.mulf %8, %8 : vector<16x3xf32>
    %cst_5 = arith.constant dense<0.000000e+00> : vector<16xf32>
    %10 = vector.multi_reduction <add>, %9, %cst_5 [1] : vector<16x3xf32> to vector<16xf32>
    %11 = vector.shape_cast %10 : vector<16xf32> to vector<16x1xf32>
    %cst_6 = arith.constant 3.000000e+00 : f32
    %12 = vector.broadcast %cst_6 : f32 to vector<16x1xf32>
    %13 = arith.divf %11, %12 : vector<16x1xf32>
    %14 = vector.broadcast %6 : vector<16x1xf32> to vector<16x3xf32>
    %15 = arith.subf %0, %14 : vector<16x3xf32>
    %cst_7 = arith.constant 9.99999974E-6 : f32
    %16 = vector.broadcast %cst_7 : f32 to vector<16x1xf32>
    %17 = arith.addf %13, %16 : vector<16x1xf32>
    %18 = math.rsqrt %17 : vector<16x1xf32>
    %19 = vector.broadcast %18 : vector<16x1xf32> to vector<16x3xf32>
    %20 = arith.mulf %15, %19 : vector<16x3xf32>
    %21 = vector.broadcast %1 : vector<1x3xf32> to vector<16x3xf32>
    %22 = arith.mulf %20, %21 : vector<16x3xf32>
    %23 = vector.broadcast %2 : vector<1x3xf32> to vector<16x3xf32>
    %24 = arith.addf %22, %23 : vector<16x3xf32>
    %c2 = arith.constant 2 : index
    %c0_8 = arith.constant 0 : index
    %25 = vector.load %arg1[%c2, %c0_8] : memref<32x128xf32, #tpu.memory_space<vmem>>, vector<3x9xf32>
    %cst_9 = arith.constant dense<0.000000e+00> : vector<16x9xf32>
    %26 = tpu.matmul %24, %25, %cst_9 {dimension_numbers = #tpu.dot_dimension_numbers<[1], [0], [0], [1], [0, 0, 1, 1], [], []>, precision = #tpu.contract_precision<fp32>} : vector<16x3xf32>, vector<3x9xf32>, vector<16x9xf32> -> vector<16x9xf32>
    %c5 = arith.constant 5 : index
    %c0_10 = arith.constant 0 : index
    %27 = vector.load %arg1[%c5, %c0_10] : memref<32x128xf32, #tpu.memory_space<vmem>>, vector<1x9xf32>
    %28 = vector.broadcast %27 : vector<1x9xf32> to vector<16x9xf32>
    %29 = arith.addf %26, %28 : vector<16x9xf32>
    %30 = vector.extract_strided_slice %29 {offsets = [0, 0], sizes = [16, 3], strides = [1, 1]} : vector<16x9xf32> to vector<16x3xf32>
    %31 = vector.extract_strided_slice %29 {offsets = [0, 3], sizes = [16, 3], strides = [1, 1]} : vector<16x9xf32> to vector<16x3xf32>
    %32 = vector.extract_strided_slice %29 {offsets = [0, 6], sizes = [16, 3], strides = [1, 1]} : vector<16x9xf32> to vector<16x3xf32>
    %33 = tpu.iota {dimensions = array<i32: 1>} : vector<1x8x8x1xi32>
    %34 = tpu.iota {dimensions = array<i32: 2>} : vector<1x8x8x1xi32>
    %35 = arith.cmpi sle, %34, %33 : vector<1x8x8x1xi32>
    %36 = vector.shape_cast %30 : vector<16x3xf32> to vector<2x8x3xf32>
    %37 = vector.shape_cast %31 : vector<16x3xf32> to vector<2x8x3xf32>
    %38 = vector.shape_cast %32 : vector<16x3xf32> to vector<2x8x3xf32>
    %39 = vector.shape_cast %36 : vector<2x8x3xf32> to vector<2x8x1x3xf32>
    %40 = vector.shape_cast %37 : vector<2x8x3xf32> to vector<2x1x8x3xf32>
    %41 = vector.broadcast %39 : vector<2x8x1x3xf32> to vector<2x8x8x3xf32>
    %42 = vector.broadcast %40 : vector<2x1x8x3xf32> to vector<2x8x8x3xf32>
    %43 = arith.mulf %41, %42 : vector<2x8x8x3xf32>
    %cst_11 = arith.constant 1.000000e+00 : f32
    %44 = vector.broadcast %cst_11 : f32 to vector<2x8x8x3xf32>
    %45 = arith.mulf %43, %44 : vector<2x8x8x3xf32>
    %cst_12 = arith.constant -1.000000e+09 : f32
    %46 = vector.shape_cast %35 : vector<1x8x8x1xi1> to vector<1x8x8x1xi1>
    %47 = vector.broadcast %46 : vector<1x8x8x1xi1> to vector<2x8x8x3xi1>
    %48 = vector.broadcast %cst_12 : f32 to vector<2x8x8x3xf32>
    %49 = arith.select %47, %45, %48 : vector<2x8x8x3xi1>, vector<2x8x8x3xf32>
    %cst_13 = arith.constant dense<0xFF800000> : vector<2x8x3xf32>
    %50 = vector.multi_reduction <maximumf>, %49, %cst_13 [2] : vector<2x8x8x3xf32> to vector<2x8x3xf32>
    %51 = vector.shape_cast %50 : vector<2x8x3xf32> to vector<2x8x1x3xf32>
    %52 = vector.broadcast %51 : vector<2x8x1x3xf32> to vector<2x8x8x3xf32>
    %53 = arith.subf %49, %52 : vector<2x8x8x3xf32>
    %54 = math.exp %53 : vector<2x8x8x3xf32>
    %cst_14 = arith.constant dense<0.000000e+00> : vector<2x8x3xf32>
    %55 = vector.multi_reduction <add>, %54, %cst_14 [2] : vector<2x8x8x3xf32> to vector<2x8x3xf32>
    %56 = vector.shape_cast %55 : vector<2x8x3xf32> to vector<2x8x1x3xf32>
    %57 = vector.broadcast %56 : vector<2x8x1x3xf32> to vector<2x8x8x3xf32>
    %58 = arith.divf %54, %57 : vector<2x8x8x3xf32>
    %59 = vector.shape_cast %38 : vector<2x8x3xf32> to vector<2x1x8x3xf32>
    %60 = vector.broadcast %59 : vector<2x1x8x3xf32> to vector<2x8x8x3xf32>
    %61 = arith.mulf %58, %60 : vector<2x8x8x3xf32>
    %cst_15 = arith.constant dense<0.000000e+00> : vector<2x8x3xf32>
    %62 = vector.multi_reduction <add>, %61, %cst_15 [2] : vector<2x8x8x3xf32> to vector<2x8x3xf32>
    %63 = vector.shape_cast %62 : vector<2x8x3xf32> to vector<16x3xf32>
    %c6 = arith.constant 6 : index
    %c0_16 = arith.constant 0 : index
    %64 = vector.load %arg1[%c6, %c0_16] : memref<32x128xf32, #tpu.memory_space<vmem>>, vector<3x3xf32>
    %cst_17 = arith.constant dense<0.000000e+00> : vector<16x3xf32>
    %65 = tpu.matmul %63, %64, %cst_17 {dimension_numbers = #tpu.dot_dimension_numbers<[1], [0], [0], [1], [0, 0, 1, 1], [], []>, precision = #tpu.contract_precision<fp32>} : vector<16x3xf32>, vector<3x3xf32>, vector<16x3xf32> -> vector<16x3xf32>
    %c9 = arith.constant 9 : index
    %c0_18 = arith.constant 0 : index
    %66 = vector.load %arg1[%c9, %c0_18] : memref<32x128xf32, #tpu.memory_space<vmem>>, vector<1x3xf32>
    %67 = vector.broadcast %66 : vector<1x3xf32> to vector<16x3xf32>
    %68 = arith.addf %65, %67 : vector<16x3xf32>
    %69 = arith.addf %0, %68 : vector<16x3xf32>
    %c10 = arith.constant 10 : index
    %c0_19 = arith.constant 0 : index
    %70 = vector.load %arg1[%c10, %c0_19] : memref<32x128xf32, #tpu.memory_space<vmem>>, vector<1x3xf32>
    %c11 = arith.constant 11 : index
    %c0_20 = arith.constant 0 : index
    %71 = vector.load %arg1[%c11, %c0_20] : memref<32x128xf32, #tpu.memory_space<vmem>>, vector<1x3xf32>
    %cst_21 = arith.constant dense<0.000000e+00> : vector<16xf32>
    %72 = vector.multi_reduction <add>, %69, %cst_21 [1] : vector<16x3xf32> to vector<16xf32>
    %73 = vector.shape_cast %72 : vector<16xf32> to vector<16x1xf32>
    %cst_22 = arith.constant 3.000000e+00 : f32
    %74 = vector.broadcast %cst_22 : f32 to vector<16x1xf32>
    %75 = arith.divf %73, %74 : vector<16x1xf32>
    %76 = vector.broadcast %75 : vector<16x1xf32> to vector<16x3xf32>
    %77 = arith.subf %69, %76 : vector<16x3xf32>
    %78 = arith.mulf %77, %77 : vector<16x3xf32>
    %cst_23 = arith.constant dense<0.000000e+00> : vector<16xf32>
    %79 = vector.multi_reduction <add>, %78, %cst_23 [1] : vector<16x3xf32> to vector<16xf32>
    %80 = vector.shape_cast %79 : vector<16xf32> to vector<16x1xf32>
    %cst_24 = arith.constant 3.000000e+00 : f32
    %81 = vector.broadcast %cst_24 : f32 to vector<16x1xf32>
    %82 = arith.divf %80, %81 : vector<16x1xf32>
    %83 = vector.broadcast %75 : vector<16x1xf32> to vector<16x3xf32>
    %84 = arith.subf %69, %83 : vector<16x3xf32>
    %cst_25 = arith.constant 9.99999974E-6 : f32
    %85 = vector.broadcast %cst_25 : f32 to vector<16x1xf32>
    %86 = arith.addf %82, %85 : vector<16x1xf32>
    %87 = math.rsqrt %86 : vector<16x1xf32>
    %88 = vector.broadcast %87 : vector<16x1xf32> to vector<16x3xf32>
    %89 = arith.mulf %84, %88 : vector<16x3xf32>
    %90 = vector.broadcast %70 : vector<1x3xf32> to vector<16x3xf32>
    %91 = arith.mulf %89, %90 : vector<16x3xf32>
    %92 = vector.broadcast %71 : vector<1x3xf32> to vector<16x3xf32>
    %93 = arith.addf %91, %92 : vector<16x3xf32>
    %c12 = arith.constant 12 : index
    %c0_26 = arith.constant 0 : index
    %94 = vector.load %arg1[%c12, %c0_26] : memref<32x128xf32, #tpu.memory_space<vmem>>, vector<3x12xf32>
    %cst_27 = arith.constant dense<0.000000e+00> : vector<16x12xf32>
    %95 = tpu.matmul %93, %94, %cst_27 {dimension_numbers = #tpu.dot_dimension_numbers<[1], [0], [0], [1], [0, 0, 1, 1], [], []>, precision = #tpu.contract_precision<fp32>} : vector<16x3xf32>, vector<3x12xf32>, vector<16x12xf32> -> vector<16x12xf32>
    %c15 = arith.constant 15 : index
    %c0_28 = arith.constant 0 : index
    %96 = vector.load %arg1[%c15, %c0_28] : memref<32x128xf32, #tpu.memory_space<vmem>>, vector<1x12xf32>
    %97 = vector.broadcast %96 : vector<1x12xf32> to vector<16x12xf32>
    %98 = arith.addf %95, %97 : vector<16x12xf32>
    %cst_29 = arith.constant 5.000000e-01 : f32
    %99 = vector.broadcast %cst_29 : f32 to vector<16x12xf32>
    %100 = arith.mulf %99, %98 : vector<16x12xf32>
    %cst_30 = arith.constant 0.707106769 : f32
    %101 = vector.broadcast %cst_30 : f32 to vector<16x12xf32>
    %102 = arith.mulf %98, %101 : vector<16x12xf32>
    %103 = math.absf %102 : vector<16x12xf32>
    %cst_31 = arith.constant 0.327591091 : f32
    %104 = vector.broadcast %cst_31 : f32 to vector<16x12xf32>
    %105 = arith.mulf %104, %103 : vector<16x12xf32>
    %cst_32 = arith.constant 1.000000e+00 : f32
    %106 = vector.broadcast %cst_32 : f32 to vector<16x12xf32>
    %107 = arith.addf %106, %105 : vector<16x12xf32>
    %cst_33 = arith.constant 1.000000e+00 : f32
    %108 = vector.broadcast %cst_33 : f32 to vector<16x12xf32>
    %109 = arith.divf %108, %107 : vector<16x12xf32>
    %cst_34 = arith.constant 1.06140542 : f32
    %110 = vector.broadcast %cst_34 : f32 to vector<16x12xf32>
    %111 = arith.mulf %110, %109 : vector<16x12xf32>
    %cst_35 = arith.constant -1.45315206 : f32
    %112 = vector.broadcast %cst_35 : f32 to vector<16x12xf32>
    %113 = arith.addf %111, %112 : vector<16x12xf32>
    %114 = arith.mulf %113, %109 : vector<16x12xf32>
    %cst_36 = arith.constant 1.42141378 : f32
    %115 = vector.broadcast %cst_36 : f32 to vector<16x12xf32>
    %116 = arith.addf %114, %115 : vector<16x12xf32>
    %117 = arith.mulf %116, %109 : vector<16x12xf32>
    %cst_37 = arith.constant -0.284496725 : f32
    %118 = vector.broadcast %cst_37 : f32 to vector<16x12xf32>
    %119 = arith.addf %117, %118 : vector<16x12xf32>
    %120 = arith.mulf %119, %109 : vector<16x12xf32>
    %cst_38 = arith.constant 0.254829586 : f32
    %121 = vector.broadcast %cst_38 : f32 to vector<16x12xf32>
    %122 = arith.addf %120, %121 : vector<16x12xf32>
    %123 = arith.mulf %122, %109 : vector<16x12xf32>
    %cst_39 = arith.constant 0.000000e+00 : f32
    %124 = vector.broadcast %cst_39 : f32 to vector<16x12xf32>
    %125 = arith.subf %124, %103 : vector<16x12xf32>
    %126 = arith.mulf %125, %103 : vector<16x12xf32>
    %127 = math.exp %126 : vector<16x12xf32>
    %128 = arith.mulf %123, %127 : vector<16x12xf32>
    %cst_40 = arith.constant 1.000000e+00 : f32
    %129 = vector.broadcast %cst_40 : f32 to vector<16x12xf32>
    %130 = arith.subf %129, %128 : vector<16x12xf32>
    %cst_41 = arith.constant 0.000000e+00 : f32
    %131 = vector.broadcast %cst_41 : f32 to vector<16x12xf32>
    %132 = arith.cmpf oge, %102, %131 : vector<16x12xf32>
    %cst_42 = arith.constant 0.000000e+00 : f32
    %133 = vector.broadcast %cst_42 : f32 to vector<16x12xf32>
    %134 = arith.subf %133, %130 : vector<16x12xf32>
    %135 = arith.select %132, %130, %134 : vector<16x12xi1>, vector<16x12xf32>
    %cst_43 = arith.constant 1.000000e+00 : f32
    %136 = vector.broadcast %cst_43 : f32 to vector<16x12xf32>
    %137 = arith.addf %136, %135 : vector<16x12xf32>
    %138 = arith.mulf %100, %137 : vector<16x12xf32>
    %c16 = arith.constant 16 : index
    %c0_44 = arith.constant 0 : index
    %139 = vector.load %arg1[%c16, %c0_44] : memref<32x128xf32, #tpu.memory_space<vmem>>, vector<12x3xf32>
    %cst_45 = arith.constant dense<0.000000e+00> : vector<16x3xf32>
    %140 = tpu.matmul %138, %139, %cst_45 {dimension_numbers = #tpu.dot_dimension_numbers<[1], [0], [0], [1], [0, 0, 1, 1], [], []>, precision = #tpu.contract_precision<fp32>} : vector<16x12xf32>, vector<12x3xf32>, vector<16x3xf32> -> vector<16x3xf32>
    %c28 = arith.constant 28 : index
    %c0_46 = arith.constant 0 : index
    %141 = vector.load %arg1[%c28, %c0_46] : memref<32x128xf32, #tpu.memory_space<vmem>>, vector<1x3xf32>
    %142 = vector.broadcast %141 : vector<1x3xf32> to vector<16x3xf32>
    %143 = arith.addf %140, %142 : vector<16x3xf32>
    %144 = arith.addf %69, %143 : vector<16x3xf32>
    %145 = tpu.transpose %144, [1, 0] : vector<16x3xf32> -> vector<3x16xf32>
    %c0_47 = arith.constant 0 : index
    %c0_48 = arith.constant 0 : index
    %146 = vector.load %arg2[%c0_47, %c0_48] : memref<3x16xf32, #tpu.memory_space<vmem>>, vector<3x16xf32>
    tpu.vector_store %arg2[%c0_47, %c0_48], %145 {strides = array<i32>} : memref<3x16xf32, #tpu.memory_space<vmem>>, vector<3x16xf32>,
    return
  }
}

</mosaic_0001>

<bundles_post_ra>
// kernel: tpu_custom_call.1
= control target key start
LH: loop header
LB: loop body
LE: loop exit
PB: predicated region body
PF: predicated region fallthrough
CT: control target
= control target key end

     0   :  { %7 = vsyncpa [#allocation3], 0  ;;  %s2770_s0 = inlined_call_operand.vmem [shape: f32[16,3], index: 0, kind: input, shape index: {}]   ;;  %s2771_s1 = inlined_call_operand.hbm [shape: f32[32,128], index: 1, kind: input, shape index: {}]   ;;  %s2772_s2 = inlined_call_operand.hbm [shape: f32[3,16], index: 2, kind: output, shape index: {}]  }
   0x1   :  { %8 = vsyncpa [#allocation4], 0  ;;  %s15_s11 = sshll.u32 %s2771_s1, 4  ;;  %s1995_s12 = smov [#allocation2]   ;;  %s16_s11 = int_to_ptr.hbm [resolvable:$true] %s15_s11 }
   0x2   :  { %s17_s13 = sshll.u32 %s1995_s12, 4  ;;  %s1996_s14 = smov 128   ;;  %s18_s13 = int_to_ptr.vmem [resolvable:$true] %s17_s13 }
   0x3   :  { %s1997_s15 = smov 8  }
   0x4   :  { %23 = dma.hbm_to_vmem [thread:$0]  %s16_s11, 512, %s18_s13, [#allocation3], %s1996_s14, %s1996_s14, %s1997_s15  }
   0x5   :  { %1991 = dma.done.wait [#allocation3], 512  }
   0x6   :  { %1992 = vsyncadd [#allocation3], 4294966784  ;;  %vm32_vm0 = vcmask 23552   ;;  %v28_v0 = vld [vmem:[%s2770_s0] sm:$0xff]  ;;  %v29_v2 = vld [vmem:[%s2770_s0 + $0x8] sm:$0xff]  ;;  %v1998_v4 = vmov 3.0  }
   0x7   :  { %v33_v1 = vsel %vm32_vm0, %v28_v0, 0.0  ;;  %v36_v3 = vsel %vm32_vm0, %v29_v2, 0.0  ;;  %1859 = vrcp.f32 %v1998_v4  ;;  %v90_v21 = vld [vmem:[#allocation2 + $0x2] sm:$0x7]  ;;  %vm99_vm2 = vcmask 1042432   ;;  %s1999_s1 = smov 122  }
   0x8   :  { %34 = vadd.xlane.f32.xlu0 %v33_v1  ;;  %v101_v22 = vsel %vm99_vm2, %v90_v21, 0  ;;  %v1851_v42 = vld [vmem:[#allocation2] ss:$0 sm:$0xff]  ;;  %v1852_v46 = vld [vmem:[#allocation2 + $0x1] ss:$0 sm:$0xff]  ;;  %s2000_s20 = smov 125  }
   0x9   :  { %v118_v23 = vand.u32 4294901760, %v101_v22  ;;  %s1833_s28 = sshll.u32 %s2772_s2, 4  ;;  %s1834_s28 = int_to_ptr.hbm [resolvable:$true] %s1833_s28 }
   0xb   :  { %v153_v24 = vsub.f32 %v101_v22, %v118_v23  ;;  %212 = vmatpush.msra.mxu3 %v118_v23  ;;  %119 = vmatpush.msra.mxu0 %v118_v23 }
   0xd   :  { %v1860_v5 = vpop.eup %1859  ;;  %v154_v25 = vand.u32 4294901760, %v153_v24  ;;  %184 = vmatpush.msra.mxu2 %v153_v24 }
   0xe   :  { %v40_v6 = vmul.f32 3.0, %v1860_v5  ;;  %vm44_vm1 = vweird.f32 %v1860_v5 }
   0xf   :  { %v155_v26 = vsub.f32 %v153_v24, %v154_v25  ;;  %244 = vmatpush.msrb.mxu0 %v154_v25 }
  0x10   :  { %37 = vadd.xlane.f32.xlu0 %v36_v3  ;;  %v41_v7 = vsub.f32 1.0, %v40_v6 }
  0x11   :  { %v156_v27 = vand.u32 4294901760, %v155_v26 }
  0x12   :  { %v42_v8 = vmul.f32 %v1860_v5, %v41_v7 }
  0x13   :  { %157 = vmatpush.msra.mxu1 %v156_v27 }
  0x14   :  { %v43_v9 = vadd.f32 %v1860_v5, %v42_v8 }
  0x15   :  { %270 = vmatpush.msrb.mxu1 %v118_v23 }
  0x16   :  { %v2028_v10 = vsel %vm44_vm1, %v1860_v5, %v43_v9  ;;  %v1853_v5 = vld [vmem:[#allocation2 + $0x5] ss:$0 sm:$0xff] }
  0x7b   :  { %v35_v11 = vpop.xlane.xlu0 %34 }
  0x7c   :  { %v46_v12 = vmul.f32 %v2028_v10, %v35_v11 }
  0x7e   :  { %v48_v13 = vsub.f32 %v28_v0, %v46_v12 }
  0x80   :  { %v50_v14 = vmul.f32 %v48_v13, %v48_v13 }
  0x82   :  { %v52_v15 = vsel %vm32_vm0, %v50_v14, 0.0 }
  0x83   :  { %53 = vadd.xlane.f32.xlu1 %v52_v15  ;;  %v38_v16 = vpop.xlane.xlu0 %37 }
  0x84   :  { %v47_v17 = vmul.f32 %v2028_v10, %v38_v16 }
  0x86   :  { %v49_v18 = vsub.f32 %v29_v2, %v47_v17 }
  0x88   :  { %v51_v19 = vmul.f32 %v49_v18, %v49_v18 }
  0x8a   :  { %v55_v20 = vsel %vm32_vm0, %v51_v19, 0.0 }
  0x8b   :  { %56 = vadd.xlane.f32.xlu1 %v55_v20 }
  0xf6   :  { %v54_v28 = vpop.xlane.xlu1 %53 }
  0xf7   :  { %v58_v29 = vmul.f32 %v54_v28, %v2028_v10 }
  0xf9   :  { %v60_v30 = vadd.f32 1e-05, %v58_v29 }
  0xfb   :  { %1861 = vrsqrt.f32 %v60_v30  ;;  %vm68_vm4 = vweird.f32 %v60_v30 }
  0xfe   :  { %v57_v31 = vpop.xlane.xlu1 %56 }
  0xff   :  { %v59_v32 = vmul.f32 %v57_v31, %v2028_v10 }
 0x101   :  { %v1862_v33 = vpop.eup %1861  ;;  %v61_v34 = vadd.f32 1e-05, %v59_v32 }
 0x102   :  { %v63_v35 = vmul.f32 %v1862_v33, %v60_v30  ;;  %vm69_vm3 = vweird.f32 %v1862_v33  ;;  %v280_v30 = vlaneseq }
 0x103   :  { %1863 = vrsqrt.f32 %v61_v34  ;;  %vm70_vm5 = vmor %vm68_vm4, %vm69_vm3  ;;  %vm78_vm7 = vweird.f32 %v61_v34 }
 0x104   :  { %v64_v36 = vmul.f32 %v1862_v33, %v63_v35  ;;  %v2043_v31 = vshrl.u32 %v280_v30, 7 }
 0x106   :  { %v65_v37 = vmul.f32 0.5, %v64_v36  ;;  %vm282_vm9 = vcmp.le.s32.totalorder %v2043_v31, 0  ;;  %vm283_vm10 = vcmp.le.s32.totalorder %v2043_v31, 1  ;;  %vm284_vm11 = vcmp.le.s32.totalorder %v2043_v31, 2 }
 0x107   :  { %vm285_vm12 = vcmp.le.s32.totalorder %v2043_v31, 3  ;;  %vm286_vm13 = vcmp.le.s32.totalorder %v2043_v31, 4  ;;  %vm287_vm14 = vcmp.le.s32.totalorder %v2043_v31, 5  ;;  %vm288_vm15 = vcmp.le.s32.totalorder %v2043_v31, 6 }
 0x108   :  { %v66_v38 = vsub.f32 1.5, %v65_v37 }
 0x109   :  { %v1864_v39 = vpop.eup %1863 }
 0x10a   :  { %v67_v40 = vmul.f32 %v1862_v33, %v66_v38  ;;  %v73_v41 = vmul.f32 %v1864_v39, %v61_v34  ;;  %vm79_vm6 = vweird.f32 %v1864_v39 }
 0x10b   :  { %vm80_vm8 = vmor %vm78_vm7, %vm79_vm6 }
 0x10c   :  { %v71_v43 = vsel %vm70_vm5, %v1862_v33, %v67_v40  ;;  %v74_v44 = vmul.f32 %v1864_v39, %v73_v41 }
 0x10d   :  { %v82_v45 = vmul.f32 %v71_v43, %v48_v13 }
 0x10e   :  { %v75_v47 = vmul.f32 0.5, %v74_v44 }
 0x10f   :  { %v85_v48 = vmul.f32 %v1851_v42, %v82_v45 }
 0x110   :  { %v76_v49 = vsub.f32 1.5, %v75_v47 }
 0x111   :  { %v88_v50 = vadd.f32 %v1852_v46, %v85_v48 }
 0x112   :  { %v77_v51 = vmul.f32 %v1864_v39, %v76_v49 }
 0x113   :  { %v94_v52 = vsel %vm32_vm0, %v88_v50, 0 }
 0x114   :  { %v81_v53 = vsel %vm80_vm8, %v1864_v39, %v77_v51  ;;  %v120_v54 = vand.u32 4294901760, %v94_v52 }
 0x115   :  { %v83_v55 = vmul.f32 %v81_v53, %v49_v18 }
 0x116   :  { %159 = vmatmul.f32.vlgmr.msra.gmra.mxu1 %v120_v54  ;;  %v121_v56 = vsub.f32 %v94_v52, %v120_v54 }
 0x117   :  { %v86_v57 = vmul.f32 %v1851_v42, %v83_v55 }
 0x118   :  { %187 = vmatmul.f32.vlgmr.msra.gmra.mxu2 %v121_v56  ;;  %v122_v58 = vand.u32 4294901760, %v121_v56 }
 0x119   :  { %v89_v59 = vadd.f32 %v1852_v46, %v86_v57 }
 0x11a   :  { %216 = vmatmul.f32.vlgmr.msra.gmra.mxu3 %v122_v58  ;;  %v123_v60 = vsub.f32 %v121_v56, %v122_v58 }
 0x11b   :  { %v97_v61 = vsel %vm32_vm0, %v89_v59, 0 }
 0x11c   :  { %v124_v62 = vand.u32 4294901760, %v123_v60  ;;  %v128_v63 = vand.u32 4294901760, %v97_v61 }
 0x11e   :  { %125 = vmatmul.f32.vlgmr.msra.gmra.mxu0 %v124_v62  ;;  %163 = vmatmul.f32.gmra.mxu1 %v128_v63  ;;  %v129_v0 = vsub.f32 %v97_v61, %v128_v63 }
 0x120   :  { %192 = vmatmul.f32.gmra.mxu2 %v129_v0  ;;  %v130_v1 = vand.u32 4294901760, %v129_v0 }
 0x122   :  { %222 = vmatmul.f32.gmra.mxu3 %v130_v1  ;;  %v131_v2 = vsub.f32 %v129_v0, %v130_v1 }
 0x124   :  { %v132_v3 = vand.u32 4294901760, %v131_v2 }
 0x126   :  { %133 = vmatmul.f32.gmra.mxu0 %v132_v3  ;;  %272 = vmatmul.f32.vlgmr.msrb.gmra.mxu1 %v120_v54 }
 0x12e   :  { %246 = vmatmul.f32.vlgmr.msrb.gmra.mxu0 %v120_v54  ;;  %276 = vmatmul.f32.gmra.mxu1 %v128_v63 }
 0x136   :  { %250 = vmatmul.f32.gmra.mxu0 %v128_v63 }
 0x193   :  { %v160_v4 = vpop.f32.mrf.mxu1 }
 0x19b   :  { %v126_v6 = vpop.f32.mrf.mxu0  ;;  %v164_v8 = vpop.f32.mrf.mxu1 }
 0x19c   :  { %v127_v7 = vadd.f32 %v1853_v5, %v126_v6  ;;  %v188_v11 = vpop.f32.mrf.mxu2 }
 0x19d   :  { %v217_v15 = vpop.f32.mrf.mxu3 }
 0x19e   :  { %v161_v9 = vadd.f32 %v160_v4, %v127_v7 }
 0x1a0   :  { %v189_v13 = vadd.f32 %v188_v11, %v161_v9 }
 0x1a2   :  { %v218_v16 = vadd.f32 %v217_v15, %v189_v13 }
 0x1a3   :  { %v134_v12 = vpop.f32.mrf.mxu0  ;;  %v273_v18 = vpop.f32.mrf.mxu1 }
 0x1a4   :  { %v135_v14 = vadd.f32 %v1853_v5, %v134_v12  ;;  %v193_v21 = vpop.f32.mrf.mxu2 }
 0x1a5   :  { %v223_v24 = vpop.f32.mrf.mxu3 }
 0x1a6   :  { %v165_v17 = vadd.f32 %v164_v8, %v135_v14 }
 0x1a8   :  { %v194_v22 = vadd.f32 %v193_v21, %v165_v17 }
 0x1aa   :  { %v224_v25 = vadd.f32 %v223_v24, %v194_v22 }
 0x1ab   :  { %v247_v19 = vpop.f32.mrf.mxu0  ;;  %v277_v28 = vpop.f32.mrf.mxu1 }
 0x1ac   :  { %v248_v20 = vadd.f32 %v247_v19, %v218_v16 }
 0x1ae   :  { %v274_v23 = vadd.f32 %v273_v18, %v248_v20 }
 0x1b0   :  { %904 = vrot.lane.b32.xlu0 %v274_v23, %s1999_s1  ;;  %338 = vrot.lane.b32.xlu2 %v274_v23, %s2000_s20  ;;  %v292_v32 = vrot.slane %v274_v23, 1  ;;  %v293_v33 = vrot.slane %v274_v23, 2  ;;  %v294_v34 = vrot.slane %v274_v23, 3  ;;  %v295_v35 = vrot.slane %v274_v23, 4 }
 0x1b1   :  { %v296_v36 = vrot.slane %v274_v23, 5  ;;  %v297_v37 = vrot.slane %v274_v23, 6  ;;  %v298_v38 = vrot.slane %v274_v23, 7  ;;  %v306_v42 = vperm.slane %v274_v23, 0 }
 0x1b2   :  { %v307_v43 = vperm.slane %v292_v32, 0  ;;  %v308_v44 = vperm.slane %v293_v33, 0  ;;  %v309_v45 = vperm.slane %v294_v34, 0  ;;  %v310_v46 = vperm.slane %v295_v35, 0 }
 0x1b3   :  { %v251_v26 = vpop.f32.mrf.mxu0  ;;  %v311_v47 = vperm.slane %v296_v36, 0  ;;  %v312_v48 = vperm.slane %v297_v37, 0  ;;  %v313_v50 = vperm.slane %v298_v38, 0 }
 0x1b4   :  { %v252_v27 = vadd.f32 %v251_v26, %v224_v25 }
 0x1b6   :  { %v2039_v29 = vadd.f32 %v277_v28, %v252_v27 }
 0x1b8   :  { %906 = vrot.lane.b32.xlu1 %v2039_v29, %s1999_s1  ;;  %340 = vrot.lane.b32.xlu2 %v2039_v29, %s2000_s20  ;;  %v299_v39 = vrot.slane %v2039_v29, 1  ;;  %v300_v40 = vrot.slane %v2039_v29, 2  ;;  %v301_v41 = vrot.slane %v2039_v29, 3  ;;  %v302_v49 = vrot.slane %v2039_v29, 4 }
 0x1b9   :  { %v303_v51 = vrot.slane %v2039_v29, 5  ;;  %v304_v52 = vrot.slane %v2039_v29, 6  ;;  %v305_v53 = vrot.slane %v2039_v29, 7  ;;  %v314_v55 = vperm.slane %v2039_v29, 0 }
 0x1ba   :  { %v2060_v56 = vperm.slane %v299_v39, 0  ;;  %v2062_v57 = vperm.slane %v300_v40, 0  ;;  %v2064_v58 = vperm.slane %v301_v41, 0  ;;  %v2066_v2 = vperm.slane %v302_v49, 0 }
 0x20a   :  { %v339_v54 = vpop.permute.xlu2 %338 }
 0x20b   :  { %v344_v59 = vmul.f32 %v339_v54, %v306_v42  ;;  %v345_v60 = vmul.f32 %v339_v54, %v307_v43  ;;  %v346_v61 = vmul.f32 %v339_v54, %v308_v44  ;;  %v347_v62 = vmul.f32 %v339_v54, %v309_v45 }
 0x20c   :  { %v348_v63 = vmul.f32 %v339_v54, %v310_v46  ;;  %v349_v0 = vmul.f32 %v339_v54, %v311_v47  ;;  %v350_v1 = vmul.f32 %v339_v54, %v312_v48  ;;  %v2080_v6 = vmul.f32 %v339_v54, %v313_v50 }
 0x20d   :  { %v2070_v3 = vsel %vm282_vm9, %v344_v59, -1e+09  ;;  %v2074_v4 = vsel %vm283_vm10, %v345_v60, -1e+09  ;;  %v2078_v5 = vsel %vm284_vm11, %v346_v61, -1e+09 }
 0x20e   :  { %v2084_v7 = vsel %vm285_vm12, %v347_v62, -1e+09  ;;  %v2088_v8 = vsel %vm286_vm13, %v348_v63, -1e+09  ;;  %v2092_v9 = vsel %vm287_vm14, %v349_v0, -1e+09 }
 0x20f   :  { %v2096_v11 = vsel %vm288_vm15, %v350_v1, -1e+09  ;;  %v392_v12 = vsel %vm32_vm0, %v2070_v3, -inf  ;;  %v399_v13 = vsel %vm32_vm0, %v2074_v4, -inf  ;;  %v406_v14 = vsel %vm32_vm0, %v2078_v5, -inf }
 0x210   :  { %v393_v15 = vrot.slane %v392_v12, 4  ;;  %v400_v16 = vrot.slane %v399_v13, 4  ;;  %v407_v17 = vrot.slane %v406_v14, 4  ;;  %v413_v18 = vsel %vm32_vm0, %v2084_v7, -inf }
 0x211   :  { %v414_v19 = vrot.slane %v413_v18, 4  ;;  %v420_v20 = vsel %vm32_vm0, %v2088_v8, -inf  ;;  %v427_v21 = vsel %vm32_vm0, %v2092_v9, -inf  ;;  %v434_v22 = vsel %vm32_vm0, %v2096_v11, -inf }
 0x212   :  { %v394_v23 = vmax.f32 %v392_v12, %v393_v15  ;;  %v401_v24 = vmax.f32 %v399_v13, %v400_v16  ;;  %v408_v25 = vmax.f32 %v406_v14, %v407_v17  ;;  %v421_v26 = vrot.slane %v420_v20, 4 }
 0x213   :  { %v415_v27 = vmax.f32 %v413_v18, %v414_v19  ;;  %v428_v28 = vrot.slane %v427_v21, 4  ;;  %v435_v30 = vrot.slane %v434_v22, 4  ;;  %v441_v32 = vsel %vm32_vm0, %v2080_v6, -inf }
 0x214   :  { %v395_v33 = vrot.slane %v394_v23, 2  ;;  %v402_v34 = vrot.slane %v401_v24, 2  ;;  %v409_v35 = vrot.slane %v408_v25, 2  ;;  %v422_v36 = vmax.f32 %v420_v20, %v421_v26  ;;  %v341_v26 = vpop.permute.xlu2 %340 }
 0x215   :  { %v416_v37 = vrot.slane %v415_v27, 2  ;;  %v429_v38 = vmax.f32 %v427_v21, %v428_v28  ;;  %v436_v39 = vmax.f32 %v434_v22, %v435_v30  ;;  %v442_v40 = vrot.slane %v441_v32, 4 }
 0x216   :  { %v396_v41 = vmax.f32 %v394_v23, %v395_v33  ;;  %v403_v42 = vmax.f32 %v401_v24, %v402_v34  ;;  %v410_v43 = vmax.f32 %v408_v25, %v409_v35  ;;  %v423_v44 = vrot.slane %v422_v36, 2 }
 0x217   :  { %v417_v45 = vmax.f32 %v415_v27, %v416_v37  ;;  %v430_v46 = vrot.slane %v429_v38, 2  ;;  %v437_v47 = vrot.slane %v436_v39, 2  ;;  %v443_v48 = vmax.f32 %v441_v32, %v442_v40 }
 0x218   :  { %v397_v49 = vrot.slane %v396_v41, 1  ;;  %v404_v50 = vrot.slane %v403_v42, 1  ;;  %v411_v54 = vrot.slane %v410_v43, 1  ;;  %v424_v59 = vmax.f32 %v422_v36, %v423_v44 }
 0x219   :  { %v418_v60 = vrot.slane %v417_v45, 1  ;;  %v431_v61 = vmax.f32 %v429_v38, %v430_v46  ;;  %v438_v62 = vmax.f32 %v436_v39, %v437_v47  ;;  %v444_v63 = vrot.slane %v443_v48, 2 }
 0x21a   :  { %v398_v0 = vmax.f32 %v396_v41, %v397_v49  ;;  %v405_v1 = vmax.f32 %v403_v42, %v404_v50  ;;  %v412_v12 = vmax.f32 %v410_v43, %v411_v54  ;;  %v425_v13 = vrot.slane %v424_v59, 1 }
 0x21b   :  { %v419_v14 = vmax.f32 %v417_v45, %v418_v60  ;;  %v432_v15 = vrot.slane %v431_v61, 1  ;;  %v439_v16 = vrot.slane %v438_v62, 1  ;;  %v445_v17 = vmax.f32 %v443_v48, %v444_v63 }
 0x21c   :  { %v426_v18 = vmax.f32 %v424_v59, %v425_v13  ;;  %v504_v19 = vsub.f32 %v2070_v3, %v398_v0  ;;  %v505_v20 = vsub.f32 %v2074_v4, %v405_v1  ;;  %v506_v21 = vsub.f32 %v2078_v5, %v412_v12 }
 0x21d   :  { %v433_v22 = vmax.f32 %v431_v61, %v432_v15  ;;  %v440_v23 = vmax.f32 %v438_v62, %v439_v16  ;;  %v446_v24 = vrot.slane %v445_v17, 1  ;;  %v507_v25 = vsub.f32 %v2084_v7, %v419_v14 }
 0x21e   :  { %v508_v27 = vsub.f32 %v2088_v8, %v426_v18  ;;  %v520_v28 = vmul.f32 1.442695, %v504_v19  ;;  %v522_v30 = vmul.f32 1.442695, %v505_v20  ;;  %v524_v32 = vmul.f32 1.442695, %v506_v21 }
 0x21f   :  { %v447_v33 = vmax.f32 %v445_v17, %v446_v24  ;;  %v509_v34 = vsub.f32 %v2092_v9, %v433_v22  ;;  %v510_v3 = vsub.f32 %v2096_v11, %v440_v23  ;;  %v526_v35 = vmul.f32 1.442695, %v507_v25 }
 0x220   :  { %1865 = vpow2.f32 %v520_v28  ;;  %v528_v4 = vmul.f32 1.442695, %v508_v27  ;;  %v352_v5 = vmul.f32 %v341_v26, %v314_v55  ;;  %v353_v36 = vmul.f32 %v341_v26, %v2060_v56 }
 0x221   :  { %v511_v7 = vsub.f32 %v2080_v6, %v447_v33  ;;  %1867 = vpow2.f32 %v522_v30  ;;  %v530_v8 = vmul.f32 1.442695, %v509_v34  ;;  %v319_v37 = vperm.slane %v303_v51, 0 }
 0x222   :  { %1869 = vpow2.f32 %v524_v32  ;;  %v532_v38 = vmul.f32 1.442695, %v510_v3  ;;  %v354_v9 = vmul.f32 %v341_v26, %v2062_v57  ;;  %v355_v11 = vmul.f32 %v341_v26, %v2064_v58 }
 0x223   :  { %1871 = vpow2.f32 %v526_v35  ;;  %v534_v39 = vmul.f32 1.442695, %v511_v7  ;;  %v320_v55 = vperm.slane %v304_v52, 0  ;;  %v321_v56 = vperm.slane %v305_v53, 0 }
 0x224   :  { %1873 = vpow2.f32 %v528_v4  ;;  %v356_v6 = vmul.f32 %v341_v26, %v2066_v2  ;;  %v2136_v51 = vsel %vm282_vm9, %v352_v5, -1e+09  ;;  %v2140_v57 = vsel %vm283_vm10, %v353_v36, -1e+09 }
 0x225   :  { %1875 = vpow2.f32 %v530_v8  ;;  %v2142_v58 = vmul.f32 %v341_v26, %v319_v37  ;;  %v2144_v40 = vmul.f32 %v341_v26, %v320_v55  ;;  %v2146_v52 = vmul.f32 %v341_v26, %v321_v56 }
 0x226   :  { %v2148_v29 = vpop.eup %1865  ;;  %1877 = vpow2.f32 %v532_v38  ;;  %v2152_v53 = vsel %vm284_vm11, %v354_v9, -1e+09  ;;  %v2156_v2 = vsel %vm285_vm12, %v355_v11, -1e+09  ;;  %v448_v41 = vsel %vm32_vm0, %v2136_v51, -inf }
 0x227   :  { %v2160_v42 = vpop.eup %1867  ;;  %1879 = vpow2.f32 %v534_v39  ;;  %v552_v43 = vsel %vm32_vm0, %v2148_v29, 0.0  ;;  %v449_v44 = vrot.slane %v448_v41, 4  ;;  %v455_v45 = vsel %vm32_vm0, %v2140_v57, -inf }
 0x228   :  { %v2166_v46 = vpop.eup %1869  ;;  %v553_v47 = vrot.slane %v552_v43, 4  ;;  %v559_v48 = vsel %vm32_vm0, %v2160_v42, 0.0  ;;  %v2172_v49 = vsel %vm286_vm13, %v356_v6, -1e+09  ;;  %v456_v50 = vrot.slane %v455_v45, 4 }
 0x229   :  { %v2174_v54 = vpop.eup %1871  ;;  %v560_v59 = vrot.slane %v559_v48, 4  ;;  %v566_v60 = vsel %vm32_vm0, %v2166_v46, 0.0  ;;  %v450_v61 = vmax.f32 %v448_v41, %v449_v44  ;;  %v2180_v62 = vsel %vm32_vm0, %v2152_v53, -inf }
 0x22a   :  { %v2182_v63 = vpop.eup %1873  ;;  %v554_v0 = vadd.f32 %v553_v47, %v552_v43  ;;  %v567_v1 = vrot.slane %v566_v60, 4  ;;  %v573_v12 = vsel %vm32_vm0, %v2174_v54, 0.0  ;;  %v457_v13 = vmax.f32 %v455_v45, %v456_v50 }
 0x22b   :  { %v2186_v14 = vpop.eup %1875  ;;  %v561_v15 = vadd.f32 %v560_v59, %v559_v48  ;;  %v574_v16 = vrot.slane %v573_v12, 4  ;;  %v580_v17 = vsel %vm32_vm0, %v2182_v63, 0.0  ;;  %v451_v18 = vrot.slane %v450_v61, 2 }
 0x22c   :  { %v2190_v19 = vpop.eup %1877  ;;  %v555_v20 = vrot.slane %v554_v0, 2  ;;  %v568_v21 = vadd.f32 %v567_v1, %v566_v60  ;;  %v581_v22 = vrot.slane %v580_v17, 4  ;;  %v587_v23 = vsel %vm32_vm0, %v2186_v14, 0.0 }
 0x22d   :  { %v2194_v24 = vpop.eup %1879  ;;  %v562_v25 = vrot.slane %v561_v15, 2  ;;  %v575_v26 = vadd.f32 %v574_v16, %v573_v12  ;;  %v588_v27 = vrot.slane %v587_v23, 4  ;;  %v594_v28 = vsel %vm32_vm0, %v2190_v19, 0.0 }
 0x22e   :  { %v556_v30 = vadd.f32 %v555_v20, %v554_v0  ;;  %v569_v32 = vrot.slane %v568_v21, 2  ;;  %v582_v33 = vadd.f32 %v581_v22, %v580_v17  ;;  %v595_v34 = vrot.slane %v594_v28, 4 }
 0x22f   :  { %v563_v3 = vadd.f32 %v562_v25, %v561_v15  ;;  %v576_v35 = vrot.slane %v575_v26, 2  ;;  %v589_v4 = vadd.f32 %v588_v27, %v587_v23  ;;  %v601_v5 = vsel %vm32_vm0, %v2194_v24, 0.0 }
 0x230   :  { %v557_v36 = vrot.slane %v556_v30, 1  ;;  %v570_v7 = vadd.f32 %v569_v32, %v568_v21  ;;  %v583_v8 = vrot.slane %v582_v33, 2  ;;  %v596_v37 = vadd.f32 %v595_v34, %v594_v28 }
 0x231   :  { %v564_v38 = vrot.slane %v563_v3, 1  ;;  %v577_v9 = vadd.f32 %v576_v35, %v575_v26  ;;  %v590_v11 = vrot.slane %v589_v4, 2  ;;  %v602_v39 = vrot.slane %v601_v5, 4 }
 0x232   :  { %v2200_v55 = vadd.f32 %v557_v36, %v556_v30  ;;  %v571_v56 = vrot.slane %v570_v7, 1  ;;  %v584_v6 = vadd.f32 %v583_v8, %v582_v33  ;;  %v597_v41 = vrot.slane %v596_v37, 2 }
 0x233   :  { %v2202_v43 = vadd.f32 %v564_v38, %v563_v3  ;;  %v578_v44 = vrot.slane %v577_v9, 1  ;;  %v591_v45 = vadd.f32 %v590_v11, %v589_v4  ;;  %v603_v47 = vadd.f32 %v602_v39, %v601_v5 }
 0x234   :  { %v2204_v48 = vadd.f32 %v571_v56, %v570_v7  ;;  %v585_v50 = vrot.slane %v584_v6, 1  ;;  %v598_v59 = vadd.f32 %v597_v41, %v596_v37  ;;  %v463_v60 = vrot.slane %v2180_v62, 4 }
 0x235   :  { %v2207_v0 = vadd.f32 %v578_v44, %v577_v9  ;;  %v592_v1 = vrot.slane %v591_v45, 1  ;;  %v604_v12 = vrot.slane %v603_v47, 2  ;;  %v2212_v15 = vsel %vm287_vm14, %v2142_v58, -1e+09 }
 0x236   :  { %v2214_v16 = vadd.f32 %v585_v50, %v584_v6  ;;  %v599_v17 = vrot.slane %v598_v59, 1  ;;  %1881 = vrcp.f32 %v2200_v55  ;;  %v452_v20 = vmax.f32 %v450_v61, %v451_v18 }
 0x237   :  { %v605_v21 = vadd.f32 %v604_v12, %v603_v47  ;;  %1883 = vrcp.f32 %v2202_v43  ;;  %v2221_v22 = vsel %vm288_vm15, %v2144_v40, -1e+09  ;;  %v458_v23 = vrot.slane %v457_v13, 2 }
 0x238   :  { %v2223_v25 = vadd.f32 %v592_v1, %v591_v45  ;;  %1885 = vrcp.f32 %v2204_v48  ;;  %v453_v58 = vrot.slane %v452_v20, 1  ;;  %v464_v26 = vmax.f32 %v2180_v62, %v463_v60 }
 0x239   :  { %v2227_v27 = vadd.f32 %v599_v17, %v598_v59  ;;  %1887 = vrcp.f32 %v2207_v0  ;;  %v459_v61 = vmax.f32 %v457_v13, %v458_v23  ;;  %v469_v18 = vsel %vm32_vm0, %v2156_v2, -inf }
 0x23a   :  { %v606_v28 = vrot.slane %v605_v21, 1  ;;  %1889 = vrcp.f32 %v2214_v16  ;;  %v465_v31 = vrot.slane %v464_v26, 2  ;;  %v470_v40 = vrot.slane %v469_v18, 4 }
 0x23b   :  { %v454_v30 = vmax.f32 %v452_v20, %v453_v58  ;;  %v460_v32 = vrot.slane %v459_v61, 1  ;;  %v476_v33 = vsel %vm32_vm0, %v2172_v49, -inf  ;;  %v483_v62 = vsel %vm32_vm0, %v2212_v15, -inf }
 0x23c   :  { %v2237_v34 = vpop.eup %1881  ;;  %v466_v3 = vmax.f32 %v464_v26, %v465_v31  ;;  %v471_v13 = vmax.f32 %v469_v18, %v470_v40  ;;  %v477_v35 = vrot.slane %v476_v33, 4  ;;  %v484_v4 = vrot.slane %v483_v62, 4 }
 0x23d   :  { %v2239_v5 = vpop.eup %1883  ;;  %1891 = vrcp.f32 %v2223_v25  ;;  %v461_v36 = vmax.f32 %v459_v61, %v460_v32  ;;  %v490_v7 = vsel %vm32_vm0, %v2221_v22, -inf  ;;  %v497_v8 = vsel %vm32_vm0, %v2146_v52, -inf }
 0x23e   :  { %v2246_v37 = vpop.eup %1885  ;;  %v467_v38 = vrot.slane %v466_v3, 1  ;;  %v472_v9 = vrot.slane %v471_v13, 2  ;;  %v478_v11 = vmax.f32 %v476_v33, %v477_v35  ;;  %v485_v39 = vmax.f32 %v483_v62, %v484_v4 }
 0x23f   :  { %v2248_v56 = vpop.eup %1887  ;;  %v491_v6 = vrot.slane %v490_v7, 4  ;;  %v498_v41 = vrot.slane %v497_v8, 4  ;;  %v512_v44 = vsub.f32 %v2136_v51, %v454_v30  ;;  %v513_v45 = vsub.f32 %v2140_v57, %v461_v36 }
 0x240   :  { %v2252_v47 = vpop.eup %1889  ;;  %v468_v50 = vmax.f32 %v466_v3, %v467_v38  ;;  %v473_v59 = vmax.f32 %v471_v13, %v472_v9  ;;  %v479_v60 = vrot.slane %v478_v11, 2  ;;  %v486_v1 = vrot.slane %v485_v39, 2 }
 0x241   :  { %v492_v12 = vmax.f32 %v490_v7, %v491_v6  ;;  %v499_v17 = vmax.f32 %v497_v8, %v498_v41  ;;  %v536_v20 = vmul.f32 1.442695, %v512_v44  ;;  %v538_v23 = vmul.f32 1.442695, %v513_v45 }
 0x242   :  { %v474_v58 = vrot.slane %v473_v59, 1  ;;  %v480_v26 = vmax.f32 %v478_v11, %v479_v60  ;;  %v487_v61 = vmax.f32 %v485_v39, %v486_v1  ;;  %v514_v18 = vsub.f32 %v2152_v53, %v468_v50 }
 0x243   :  { %v2255_v31 = vpop.eup %1891  ;;  %v2257_v51 = vadd.f32 %v606_v28, %v605_v21  ;;  %v493_v57 = vrot.slane %v492_v12, 2  ;;  %v500_v40 = vrot.slane %v499_v17, 2  ;;  %1893 = vpow2.f32 %v536_v20 }
 0x244   :  { %v475_v30 = vmax.f32 %v473_v59, %v474_v58  ;;  %v481_v32 = vrot.slane %v480_v26, 1  ;;  %v488_v33 = vrot.slane %v487_v61, 1  ;;  %1895 = vpow2.f32 %v538_v23 }
 0x245   :  { %vm669_vm1 = vweird.f32 %v2200_v55  ;;  %v494_v62 = vmax.f32 %v492_v12, %v493_v57  ;;  %v501_v3 = vmax.f32 %v499_v17, %v500_v40  ;;  %v540_v13 = vmul.f32 1.442695, %v514_v18 }
 0x246   :  { %v665_v35 = vmul.f32 %v2237_v34, %v2200_v55  ;;  %v482_v53 = vmax.f32 %v480_v26, %v481_v32  ;;  %v489_v4 = vmax.f32 %v487_v61, %v488_v33  ;;  %v515_v21 = vsub.f32 %v2156_v2, %v475_v30 }
 0x247   :  { %vm670_vm3 = vweird.f32 %v2237_v34  ;;  %v495_v28 = vrot.slane %v494_v62, 1  ;;  %v502_v36 = vrot.slane %v501_v3, 1  ;;  %1897 = vpow2.f32 %v540_v13 }
 0x248   :  { %v666_v7 = vsub.f32 1.0, %v665_v35  ;;  %v516_v8 = vsub.f32 %v2172_v49, %v482_v53  ;;  %v517_v38 = vsub.f32 %v2212_v15, %v489_v4  ;;  %v542_v9 = vmul.f32 1.442695, %v515_v21  ;;  %vm671_vm5 = vmor %vm669_vm1, %vm670_vm3 }
 0x249   :  { %v673_v11 = vand.u32 2147483647, %v2200_v55  ;;  %v2267_v39 = vpop.eup %1893  ;;  %v496_v6 = vmax.f32 %v494_v62, %v495_v28  ;;  %v503_v41 = vmax.f32 %v501_v3, %v502_v36  ;;  %v675_v2 = vand.u32 2147483648, %v2200_v55 }
 0x24a   :  { %v667_v44 = vmul.f32 %v2237_v34, %v666_v7  ;;  %v2271_v45 = vpop.eup %1895  ;;  %1899 = vpow2.f32 %v542_v9  ;;  %v544_v50 = vmul.f32 1.442695, %v516_v8  ;;  %v546_v59 = vmul.f32 1.442695, %v517_v38 }
 0x24b   :  { %v608_v49 = vsel %vm32_vm0, %v2267_v39, 0.0  ;;  %v518_v15 = vsub.f32 %v2221_v22, %v496_v6  ;;  %v519_v60 = vsub.f32 %v2146_v52, %v503_v41  ;;  %v615_v12 = vsel %vm32_vm0, %v2271_v45, 0.0 }
 0x24c   :  { %v609_v1 = vrot.slane %v608_v49, 4  ;;  %1901 = vpow2.f32 %v544_v50  ;;  %v616_v17 = vrot.slane %v615_v12, 4  ;;  %v668_v20 = vadd.f32 %v2237_v34, %v667_v44 }
 0x24d   :  { %vm2280_vm4 = vcmp.eq.f32.partialorder %v673_v11, 8.507059e+37  ;;  %v2284_v58 = vpop.eup %1897  ;;  %1903 = vpow2.f32 %v546_v59  ;;  %v548_v26 = vmul.f32 1.442695, %v518_v15  ;;  %v550_v61 = vmul.f32 1.442695, %v519_v60 }
 0x24e   :  { %v610_v22 = vadd.f32 %v609_v1, %v608_v49  ;;  %v617_v52 = vadd.f32 %v616_v17, %v615_v12  ;;  %v622_v18 = vsel %vm32_vm0, %v2284_v58, 0.0  ;;  %v672_v57 = vsel %vm671_vm5, %v2237_v34, %v668_v20 }
 0x24f   :  { %v676_v40 = vor.u32 1.1754944e-38, %v675_v2  ;;  %1905 = vpow2.f32 %v548_v26  ;;  %v623_v32 = vrot.slane %v622_v18, 4  ;;  %v680_v33 = vmul.f32 %v2239_v5, %v2202_v43 }
 0x250   :  { %v611_v30 = vrot.slane %v610_v22, 2  ;;  %v2295_v62 = vpop.eup %1899  ;;  %1907 = vpow2.f32 %v550_v61  ;;  %v618_v3 = vrot.slane %v617_v52, 2  ;;  %vm684_vm6 = vweird.f32 %v2202_v43 }
 0x251   :  { %v677_v55 = vsel %vm2280_vm4, %v676_v40, %v672_v57  ;;  %1909 = vrcp.f32 %v2227_v27  ;;  %v624_v35 = vadd.f32 %v623_v32, %v622_v18  ;;  %v629_v34 = vsel %vm32_vm0, %v2295_v62, 0.0 }
 0x252   :  { %v612_v13 = vadd.f32 %v611_v30, %v610_v22  ;;  %v2302_v53 = vpop.eup %1901  ;;  %1911 = vrcp.f32 %v2257_v51  ;;  %v619_v4 = vadd.f32 %v618_v3, %v617_v52  ;;  %v630_v21 = vrot.slane %v629_v34, 4 }
 0x253   :  { %v681_v28 = vsub.f32 1.0, %v680_v33  ;;  %v2305_v36 = vpop.eup %1903  ;;  %v625_v8 = vrot.slane %v624_v35, 2  ;;  %v636_v38 = vsel %vm32_vm0, %v2302_v53, 0.0  ;;  %v2310_v9 = vmul.f32 %v2148_v29, %v677_v55 }
 0x254   :  { %v613_v7 = vrot.slane %v612_v13, 1  ;;  %v620_v11 = vrot.slane %v619_v4, 1  ;;  %v631_v6 = vadd.f32 %v630_v21, %v629_v34  ;;  %v637_v41 = vrot.slane %v636_v38, 4 }
 0x255   :  { %v643_v44 = vsel %vm32_vm0, %v2305_v36, 0.0  ;;  %v2315_v2 = vpop.eup %1905  ;;  %v626_v59 = vadd.f32 %v625_v8, %v624_v35  ;;  %v682_v15 = vmul.f32 %v2239_v5, %v681_v28  ;;  %vm685_vm7 = vweird.f32 %v2239_v5 }
 0x256   :  { %v2317_v50 = vadd.f32 %v613_v7, %v612_v13  ;;  %v644_v49 = vrot.slane %v643_v44, 4  ;;  %v2320_v60 = vpop.eup %1907  ;;  %v2322_v29 = vadd.f32 %v620_v11, %v619_v4  ;;  %v632_v1 = vrot.slane %v631_v6, 2  ;;  %vm2346_vm8 = vmor %vm684_vm6, %vm685_vm7 }
 0x257   :  { %v638_v12 = vadd.f32 %v637_v41, %v636_v38  ;;  %v650_v17 = vsel %vm32_vm0, %v2315_v2, 0.0  ;;  %v2326_v20 = vpop.eup %1909  ;;  %v627_v23 = vrot.slane %v626_v59, 1  ;;  %v657_v22 = vsel %vm32_vm0, %v2320_v60, 0.0 }
 0x258   :  { %v645_v26 = vadd.f32 %v644_v49, %v643_v44  ;;  %v651_v61 = vrot.slane %v650_v17, 4  ;;  %v2330_v52 = vpop.eup %1911  ;;  %v633_v18 = vadd.f32 %v632_v1, %v631_v6  ;;  %v658_v40 = vrot.slane %v657_v22, 4 }
 0x259   :  { %v639_v57 = vrot.slane %v638_v12, 2  ;;  %v2333_v30 = vadd.f32 %v627_v23, %v626_v59  ;;  %1913 = vrcp.f32 %v2317_v50  ;;  %v683_v35 = vadd.f32 %v2239_v5, %v682_v15 }
 0x25a   :  { %v646_v32 = vrot.slane %v645_v26, 2  ;;  %v652_v33 = vadd.f32 %v651_v61, %v650_v17  ;;  %v634_v3 = vrot.slane %v633_v18, 1  ;;  %v659_v13 = vadd.f32 %v658_v40, %v657_v22 }
 0x25b   :  { %v640_v55 = vadd.f32 %v639_v57, %v638_v12  ;;  %1915 = vrcp.f32 %v2322_v29  ;;  %v688_v21 = vand.u32 2147483647, %v2202_v43  ;;  %v690_v41 = vand.u32 2147483648, %v2202_v43 }
 0x25c   :  { %v647_v34 = vadd.f32 %v646_v32, %v645_v26  ;;  %v653_v4 = vrot.slane %v652_v33, 2  ;;  %v2339_v28 = vadd.f32 %v634_v3, %v633_v18  ;;  %v660_v8 = vrot.slane %v659_v13, 2 }
 0x25d   :  { %v641_v7 = vrot.slane %v640_v55, 1  ;;  %1917 = vrcp.f32 %v2333_v30  ;;  %v695_v44 = vmul.f32 %v2246_v37, %v2204_v48  ;;  %v687_v15 = vsel %vm2346_vm8, %v2239_v5, %v683_v35 }
 0x25e   :  { %v648_v38 = vrot.slane %v647_v34, 1  ;;  %v654_v11 = vadd.f32 %v653_v4, %v652_v33  ;;  %v661_v49 = vadd.f32 %v660_v8, %v659_v13  ;;  %1919 = vrcp.f32 %v2339_v28 }
 0x25f   :  { %v2353_v59 = vadd.f32 %v641_v7, %v640_v55  ;;  %v2359_v1 = vpop.eup %1913  ;;  %v691_v23 = vor.u32 1.1754944e-38, %v690_v41  ;;  %v696_v26 = vsub.f32 1.0, %v695_v44  ;;  %vm689_vm9 = vcmp.eq.f32.partialorder %v688_v21, 8.507059e+37 }
 0x260   :  { %v2361_v12 = vadd.f32 %v648_v38, %v647_v34  ;;  %v655_v17 = vrot.slane %v654_v11, 1  ;;  %v662_v43 = vrot.slane %v661_v49, 1  ;;  %v703_v61 = vand.u32 2147483647, %v2204_v48 }
 0x261   :  { %1921 = vrcp.f32 %v2353_v59  ;;  %v2365_v22 = vpop.eup %1915  ;;  %v692_v57 = vsel %vm689_vm9, %v691_v23, %v687_v15  ;;  %v697_v5 = vmul.f32 %v2246_v37, %v696_v26  ;;  %vm700_vm10 = vweird.f32 %v2246_v37 }
 0x262   :  { %v2367_v18 = vadd.f32 %v655_v17, %v654_v11  ;;  %v2373_v32 = vadd.f32 %v662_v43, %v661_v49  ;;  %1923 = vrcp.f32 %v2361_v12  ;;  %vm699_vm11 = vweird.f32 %v2204_v48 }
 0x263   :  { %v2371_v40 = vpop.eup %1917  ;;  %v705_v33 = vand.u32 2147483648, %v2204_v48  ;;  %v2379_v3 = vmul.f32 %v2160_v42, %v692_v57  ;;  %v698_v55 = vadd.f32 %v2246_v37, %v697_v5  ;;  %vm704_vm12 = vcmp.eq.f32.partialorder %v703_v61, 8.507059e+37  ;;  %vm701_vm13 = vmor %vm699_vm11, %vm700_vm10 }
 0x264   :  { %v710_v13 = vmul.f32 %v2248_v56, %v2207_v0  ;;  %v2384_v35 = vpop.eup %1919  ;;  %1925 = vrcp.f32 %v2367_v18  ;;  %vm714_vm14 = vweird.f32 %v2207_v0  ;;  %v718_v4 = vand.u32 2147483647, %v2207_v0 }
 0x265   :  { %v706_v34 = vor.u32 1.1754944e-38, %v705_v33  ;;  %v702_v48 = vsel %vm701_vm13, %v2246_v37, %v698_v55  ;;  %v720_v21 = vand.u32 2147483648, %v2207_v0  ;;  %v725_v7 = vmul.f32 %v2252_v47, %v2214_v16 }
 0x266   :  { %v711_v42 = vsub.f32 1.0, %v710_v13  ;;  %vm715_vm15 = vweird.f32 %v2248_v56  ;;  %vm2396_vm1 = vcmp.eq.f32.partialorder %v718_v4, 8.507059e+37  ;;  %vm729_vm3 = vweird.f32 %v2214_v16 }
 0x267   :  { %v2393_v8 = vpop.eup %1921  ;;  %v707_v38 = vsel %vm704_vm12, %v706_v34, %v702_v48  ;;  %v726_v41 = vsub.f32 1.0, %v725_v7  ;;  %vm730_vm4 = vweird.f32 %v2252_v47  ;;  %v721_v49 = vor.u32 1.1754944e-38, %v720_v21  ;;  %vm716_vm6 = vmor %vm714_vm14, %vm715_vm15 }
 0x268   :  { %v708_v6 = vmul.f32 %v2166_v46, %v707_v38  ;;  %v712_v37 = vmul.f32 %v2248_v56, %v711_v42  ;;  %v2404_v44 = vpop.eup %1923  ;;  %v733_v15 = vand.u32 2147483647, %v2214_v16  ;;  %v735_v17 = vand.u32 2147483648, %v2214_v16  ;;  %vm731_vm9 = vmor %vm729_vm3, %vm730_vm4 }
 0x269   :  { %v740_v23 = vmul.f32 %v2255_v31, %v2223_v25  ;;  %v727_v43 = vmul.f32 %v2252_v47, %v726_v41  ;;  %vm744_vm5 = vweird.f32 %v2223_v25  ;;  %v748_v46 = vand.u32 2147483647, %v2223_v25 }
 0x26a   :  { %v713_v26 = vadd.f32 %v2248_v56, %v712_v37  ;;  %v2414_v61 = vpop.eup %1925  ;;  %vm2420_vm7 = vcmp.eq.f32.partialorder %v733_v15, 8.507059e+37  ;;  %vm745_vm8 = vweird.f32 %v2255_v31  ;;  %v750_v33 = vand.u32 2147483648, %v2223_v25 }
 0x26b   :  { %v741_v5 = vsub.f32 1.0, %v740_v23  ;;  %v728_v13 = vadd.f32 %v2252_v47, %v727_v43  ;;  %v736_v34 = vor.u32 1.1754944e-38, %v735_v17  ;;  %v755_v4 = vmul.f32 %v2326_v20, %v2227_v27  ;;  %vm746_vm12 = vmor %vm744_vm5, %vm745_vm8 }
 0x26c   :  { %v717_v55 = vsel %vm716_vm6, %v2248_v56, %v713_v26  ;;  %vm2437_vm10 = vcmp.eq.f32.partialorder %v748_v46, 8.507059e+37  ;;  %v751_v56 = vor.u32 1.1754944e-38, %v750_v33  ;;  %vm759_vm11 = vweird.f32 %v2227_v27 }
 0x26d   :  { %v722_v0 = vsel %vm2396_vm1, %v721_v49, %v717_v55  ;;  %v742_v48 = vmul.f32 %v2255_v31, %v741_v5  ;;  %v732_v7 = vsel %vm731_vm9, %v2252_v47, %v728_v13  ;;  %v756_v38 = vsub.f32 1.0, %v755_v4 }
 0x26e   :  { %v723_v21 = vmul.f32 %v2174_v54, %v722_v0  ;;  %v737_v11 = vsel %vm2420_vm7, %v736_v34, %v732_v7  ;;  %v763_v37 = vand.u32 2147483647, %v2227_v27  ;;  %v765_v41 = vand.u32 2147483648, %v2227_v27 }
 0x26f   :  { %v743_v16 = vadd.f32 %v2255_v31, %v742_v48  ;;  %v738_v49 = vmul.f32 %v2182_v63, %v737_v11  ;;  %v757_v54 = vmul.f32 %v2326_v20, %v756_v38  ;;  %vm760_vm13 = vweird.f32 %v2326_v20  ;;  %v905_v63 = vpop.permute.xlu0 %904 }
 0x270   :  { %v770_v47 = vmul.f32 %v2330_v52, %v2257_v51  ;;  %vm2459_vm14 = vcmp.eq.f32.partialorder %v763_v37, 8.507059e+37  ;;  %v766_v23 = vor.u32 1.1754944e-38, %v765_v41  ;;  %vm774_vm15 = vweird.f32 %v2257_v51  ;;  %vm761_vm1 = vmor %vm759_vm11, %vm760_vm13 }
 0x271   :  { %v747_v15 = vsel %vm746_vm12, %v2255_v31, %v743_v16  ;;  %v758_v26 = vadd.f32 %v2326_v20, %v757_v54  ;;  %v778_v46 = vand.u32 2147483647, %v2257_v51  ;;  %v780_v31 = vand.u32 2147483648, %v2257_v51 }
 0x272   :  { %v752_v25 = vsel %vm2437_vm10, %v751_v56, %v747_v15  ;;  %v771_v43 = vsub.f32 1.0, %v770_v47  ;;  %v910_v5 = vmul.f32 %v905_v63, %v2310_v9  ;;  %v911_v33 = vmul.f32 %v905_v63, %v2379_v3 }
 0x273   :  { %v753_v57 = vmul.f32 %v2186_v14, %v752_v25  ;;  %v762_v55 = vsel %vm761_vm1, %v2326_v20, %v758_v26  ;;  %vm775_vm3 = vweird.f32 %v2330_v52  ;;  %v912_v34 = vmul.f32 %v905_v63, %v708_v6 }
 0x274   :  { %v772_v13 = vmul.f32 %v2330_v52, %v771_v43  ;;  %v767_v4 = vsel %vm2459_vm14, %v766_v23, %v762_v55  ;;  %vm2479_vm4 = vcmp.eq.f32.partialorder %v778_v46, 8.507059e+37  ;;  %v913_v27 = vmul.f32 %v905_v63, %v723_v21  ;;  %vm776_vm5 = vmor %vm774_vm15, %vm775_vm3 }
 0x275   :  { %v914_v0 = vmul.f32 %v905_v63, %v738_v49  ;;  %v781_v48 = vor.u32 1.1754944e-38, %v780_v31  ;;  %v915_v3 = vmul.f32 %v905_v63, %v753_v57  ;;  %v926_v20 = vsel %vm32_vm0, %v910_v5, 0.0 }
 0x276   :  { %v773_v9 = vadd.f32 %v2330_v52, %v772_v13  ;;  %v927_v42 = vrot.slane %v926_v20, 4  ;;  %v933_v6 = vsel %vm32_vm0, %v911_v33, 0.0  ;;  %v940_v56 = vsel %vm32_vm0, %v912_v34, 0.0 }
 0x277   :  { %v947_v7 = vsel %vm32_vm0, %v913_v27, 0.0  ;;  %v768_v38 = vmul.f32 %v2190_v19, %v767_v4  ;;  %v934_v11 = vrot.slane %v933_v6, 4  ;;  %v941_v16 = vrot.slane %v940_v56, 4 }
 0x278   :  { %v777_v21 = vsel %vm776_vm5, %v2330_v52, %v773_v9  ;;  %v928_v41 = vadd.f32 %v927_v42, %v926_v20  ;;  %v948_v49 = vrot.slane %v947_v7, 4  ;;  %v954_v51 = vsel %vm32_vm0, %v914_v0, 0.0 }
 0x279   :  { %v782_v37 = vsel %vm2479_vm4, %v781_v48, %v777_v21  ;;  %v935_v47 = vadd.f32 %v934_v11, %v933_v6  ;;  %v942_v15 = vadd.f32 %v941_v16, %v940_v56  ;;  %v955_v17 = vrot.slane %v954_v51, 4 }
 0x27a   :  { %v783_v54 = vmul.f32 %v2194_v24, %v782_v37  ;;  %v929_v23 = vrot.slane %v928_v41, 2  ;;  %v949_v25 = vadd.f32 %v948_v49, %v947_v7  ;;  %v2497_v19 = vsel %vm32_vm0, %v915_v3, 0.0 }
 0x27b   :  { %v785_v52 = vmul.f32 %v2359_v1, %v2317_v50  ;;  %1927 = vrcp.f32 %v2373_v32  ;;  %v2502_v26 = vmul.f32 %v905_v63, %v768_v38  ;;  %v936_v43 = vrot.slane %v935_v47, 2 }
 0x27c   :  { %v943_v46 = vrot.slane %v942_v15, 2  ;;  %v2504_v57 = vmul.f32 %v905_v63, %v783_v54  ;;  %v930_v24 = vadd.f32 %v929_v23, %v928_v41  ;;  %v950_v31 = vrot.slane %v949_v25, 2 }
 0x27d   :  { %v786_v5 = vsub.f32 1.0, %v785_v52  ;;  %v2506_v33 = vadd.f32 %v936_v43, %v935_v47  ;;  %v2510_v13 = vadd.f32 %v955_v17, %v954_v51  ;;  %v962_v34 = vrot.slane %v2497_v19, 4 }
 0x27e   :  { %v2508_v55 = vadd.f32 %v943_v46, %v942_v15  ;;  %v931_v4 = vrot.slane %v930_v24, 1  ;;  %vm790_vm6 = vweird.f32 %v2359_v1  ;;  %v793_v27 = vand.u32 2147483647, %v2317_v50 }
 0x27f   :  { %v787_v14 = vmul.f32 %v2359_v1, %v786_v5  ;;  %v2516_v63 = vadd.f32 %v950_v31, %v949_v25  ;;  %vm789_vm7 = vweird.f32 %v2317_v50  ;;  %v795_v0 = vand.u32 2147483648, %v2317_v50 }
 0x280   :  { %v800_v9 = vmul.f32 %v2365_v22, %v2322_v29  ;;  %v2522_v48 = vadd.f32 %v931_v4, %v930_v24  ;;  %v938_v3 = vrot.slane %v2506_v33, 1  ;;  %v945_v20 = vrot.slane %v2508_v55, 1  ;;  %vm791_vm8 = vmor %vm789_vm7, %vm790_vm6 }
 0x281   :  { %v788_v42 = vadd.f32 %v2359_v1, %v787_v14  ;;  %v2527_v6 = vpop.eup %1927  ;;  %vm794_vm9 = vcmp.eq.f32.partialorder %v793_v27, 8.507059e+37  ;;  %v796_v56 = vor.u32 1.1754944e-38, %v795_v0  ;;  %vm804_vm10 = vweird.f32 %v2322_v29 }
 0x282   :  { %v801_v7 = vsub.f32 1.0, %v800_v9  ;;  %v808_v38 = vand.u32 2147483647, %v2322_v29  ;;  %v810_v21 = vand.u32 2147483648, %v2322_v29  ;;  %v815_v11 = vmul.f32 %v2371_v40, %v2333_v30 }
 0x283   :  { %v792_v50 = vsel %vm791_vm8, %v2359_v1, %v788_v42  ;;  %vm805_vm11 = vweird.f32 %v2365_v22  ;;  %vm819_vm12 = vweird.f32 %v2333_v30  ;;  %vm820_vm14 = vweird.f32 %v2371_v40 }
 0x284   :  { %v797_v16 = vsel %vm794_vm9, %v796_v56, %v792_v50  ;;  %v802_v37 = vmul.f32 %v2365_v22, %v801_v7  ;;  %vm2541_vm13 = vcmp.eq.f32.partialorder %v808_v38, 8.507059e+37  ;;  %v816_v1 = vsub.f32 1.0, %v815_v11  ;;  %vm806_vm15 = vmor %vm804_vm10, %vm805_vm11 }
 0x285   :  { %v2539_v41 = vmul.f32 %v2267_v39, %v797_v16  ;;  %v823_v54 = vand.u32 2147483647, %v2333_v30  ;;  %v825_v47 = vand.u32 2147483648, %v2333_v30  ;;  %v830_v15 = vmul.f32 %v2384_v35, %v2339_v28  ;;  %vm821_vm5 = vmor %vm819_vm12, %vm820_vm14 }
 0x286   :  { %v803_v51 = vadd.f32 %v2365_v22, %v802_v37  ;;  %v811_v39 = vor.u32 1.1754944e-38, %v810_v21  ;;  %v817_v17 = vmul.f32 %v2371_v40, %v816_v1  ;;  %vm834_vm1 = vweird.f32 %v2339_v28 }
 0x287   :  { %v838_v23 = vand.u32 2147483647, %v2339_v28  ;;  %vm2557_vm3 = vcmp.eq.f32.partialorder %v823_v54, 8.507059e+37  ;;  %v831_v43 = vsub.f32 1.0, %v830_v15  ;;  %vm835_vm4 = vweird.f32 %v2384_v35 }
 0x288   :  { %v807_v25 = vsel %vm806_vm15, %v2365_v22, %v803_v51  ;;  %v818_v46 = vadd.f32 %v2371_v40, %v817_v17  ;;  %v826_v24 = vor.u32 1.1754944e-38, %v825_v47  ;;  %v840_v31 = vand.u32 2147483648, %v2339_v28  ;;  %vm836_vm8 = vmor %vm834_vm1, %vm835_vm4 }
 0x289   :  { %v812_v29 = vsel %vm2541_vm13, %v811_v39, %v807_v25  ;;  %v832_v22 = vmul.f32 %v2384_v35, %v831_v43  ;;  %vm2572_vm6 = vcmp.eq.f32.partialorder %v838_v23, 8.507059e+37  ;;  %v845_v14 = vmul.f32 %v2393_v8, %v2353_v59 }
 0x28a   :  { %v813_v5 = vmul.f32 %v2271_v45, %v812_v29  ;;  %v822_v27 = vsel %vm821_vm5, %v2371_v40, %v818_v46  ;;  %v841_v0 = vor.u32 1.1754944e-38, %v840_v31  ;;  %vm849_vm7 = vweird.f32 %v2353_v59  ;;  %v907_v29 = vpop.permute.xlu1 %906 }
 0x28b   :  { %v853_v45 = vand.u32 2147483647, %v2353_v59  ;;  %v827_v30 = vsel %vm2557_vm3, %v826_v24, %v822_v27  ;;  %v833_v9 = vadd.f32 %v2384_v35, %v832_v22  ;;  %v846_v42 = vsub.f32 1.0, %v845_v14 }
 0x28c   :  { %v855_v56 = vand.u32 2147483648, %v2353_v59  ;;  %v828_v7 = vmul.f32 %v2284_v58, %v827_v30  ;;  %vm850_vm9 = vweird.f32 %v2393_v8  ;;  %v860_v50 = vmul.f32 %v2404_v44, %v2361_v12 }
 0x28d   :  { %vm2591_vm10 = vcmp.eq.f32.partialorder %v853_v45, 8.507059e+37  ;;  %v837_v38 = vsel %vm836_vm8, %v2384_v35, %v833_v9  ;;  %v847_v21 = vmul.f32 %v2393_v8, %v846_v42  ;;  %vm864_vm11 = vweird.f32 %v2361_v12  ;;  %vm851_vm13 = vmor %vm849_vm7, %vm850_vm9 }
 0x28e   :  { %v856_v11 = vor.u32 1.1754944e-38, %v855_v56  ;;  %v842_v58 = vsel %vm2572_vm6, %v841_v0, %v837_v38  ;;  %v861_v28 = vsub.f32 1.0, %v860_v50  ;;  %v868_v16 = vand.u32 2147483647, %v2361_v12 }
 0x28f   :  { %v870_v37 = vand.u32 2147483648, %v2361_v12  ;;  %v843_v49 = vmul.f32 %v2295_v62, %v842_v58  ;;  %v848_v1 = vadd.f32 %v2393_v8, %v847_v21  ;;  %vm865_vm12 = vweird.f32 %v2404_v44  ;;  %v1038_v58 = vld [vmem:[#allocation2 + $0x6] sm:$0x7] }
 0x290   :  { %v875_v35 = vmul.f32 %v2414_v61, %v2367_v18  ;;  %v862_v51 = vmul.f32 %v2404_v44, %v861_v28  ;;  %vm2614_vm14 = vcmp.eq.f32.partialorder %v868_v16, 8.507059e+37  ;;  %vm879_vm15 = vweird.f32 %v2367_v18  ;;  %vm866_vm3 = vmor %vm864_vm11, %vm865_vm12 }
 0x291   :  { %v871_v47 = vor.u32 1.1754944e-38, %v870_v37  ;;  %v852_v62 = vsel %vm851_vm13, %v2393_v8, %v848_v1  ;;  %v883_v39 = vand.u32 2147483647, %v2367_v18  ;;  %v885_v17 = vand.u32 2147483648, %v2367_v18 }
 0x292   :  { %v876_v15 = vsub.f32 1.0, %v875_v35  ;;  %v857_v59 = vsel %vm2591_vm10, %v856_v11, %v852_v62  ;;  %v863_v23 = vadd.f32 %v2404_v44, %v862_v51  ;;  %vm880_vm1 = vweird.f32 %v2414_v61 }
 0x293   :  { %v890_v25 = vmul.f32 %v2527_v6, %v2373_v32  ;;  %v858_v52 = vmul.f32 %v2302_v53, %v857_v59  ;;  %vm2634_vm4 = vcmp.eq.f32.partialorder %v883_v39, 8.507059e+37  ;;  %vm894_vm5 = vweird.f32 %v2373_v32  ;;  %vm881_vm6 = vmor %vm879_vm15, %vm880_vm1 }
 0x294   :  { %v877_v8 = vmul.f32 %v2414_v61, %v876_v15  ;;  %v867_v46 = vsel %vm866_vm3, %v2404_v44, %v863_v23  ;;  %v886_v24 = vor.u32 1.1754944e-38, %v885_v17  ;;  %v898_v53 = vand.u32 2147483647, %v2373_v32 }
 0x295   :  { %v891_v31 = vsub.f32 1.0, %v890_v25  ;;  %v872_v22 = vsel %vm2614_vm14, %v871_v47, %v867_v46  ;;  %v900_v4 = vand.u32 2147483648, %v2373_v32  ;;  %v918_v14 = vmul.f32 %v907_v29, %v2539_v41 }
 0x296   :  { %v878_v12 = vadd.f32 %v2414_v61, %v877_v8  ;;  %v873_v27 = vmul.f32 %v2305_v36, %v872_v22  ;;  %vm895_vm7 = vweird.f32 %v2527_v6  ;;  %v919_v0 = vmul.f32 %v907_v29, %v813_v5 }
 0x297   :  { %v892_v44 = vmul.f32 %v2527_v6, %v891_v31  ;;  %vm2654_vm8 = vcmp.eq.f32.partialorder %v898_v53, 8.507059e+37  ;;  %v920_v9 = vmul.f32 %v907_v29, %v828_v7  ;;  %v921_v41 = vmul.f32 %v907_v29, %v843_v49  ;;  %vm896_vm9 = vmor %vm894_vm5, %vm895_vm7 }
 0x298   :  { %v882_v45 = vsel %vm881_vm6, %v2414_v61, %v878_v12  ;;  %v901_v18 = vor.u32 1.1754944e-38, %v900_v4  ;;  %v922_v56 = vmul.f32 %v907_v29, %v858_v52  ;;  %v982_v61 = vsel %vm32_vm0, %v918_v14, 0.0 }
 0x299   :  { %v887_v36 = vsel %vm2634_vm4, %v886_v24, %v882_v45  ;;  %v893_v42 = vadd.f32 %v2527_v6, %v892_v44  ;;  %v989_v5 = vsel %vm32_vm0, %v919_v0, 0.0  ;;  %v996_v50 = vsel %vm32_vm0, %v920_v9, 0.0 }
 0x29a   :  { %v888_v40 = vmul.f32 %v2315_v2, %v887_v36  ;;  %v983_v38 = vrot.slane %v982_v61, 4  ;;  %v990_v21 = vrot.slane %v989_v5, 4  ;;  %v997_v11 = vrot.slane %v996_v50, 4 }
 0x29b   :  { %v897_v7 = vsel %vm896_vm9, %v2527_v6, %v893_v42  ;;  %v923_v16 = vmul.f32 %v907_v29, %v873_v27  ;;  %v1003_v2 = vsel %vm32_vm0, %v921_v41, 0.0  ;;  %v1010_v32 = vsel %vm32_vm0, %v922_v56, 0.0 }
 0x29c   :  { %v902_v28 = vsel %vm2654_vm8, %v901_v18, %v897_v7  ;;  %v984_v49 = vadd.f32 %v983_v38, %v982_v61  ;;  %v991_v1 = vadd.f32 %v990_v21, %v989_v5  ;;  %v998_v35 = vadd.f32 %v997_v11, %v996_v50 }
 0x29d   :  { %v903_v37 = vmul.f32 %v2320_v60, %v902_v28  ;;  %v939_v6 = vadd.f32 %v938_v3, %v2506_v33  ;;  %v1004_v51 = vrot.slane %v1003_v2, 4  ;;  %v1011_v54 = vrot.slane %v1010_v32, 4 }
 0x29e   :  { %v1083_v47 = vsel %vm99_vm2, %v1038_v58, 0  ;;  %v2677_v62 = vmul.f32 %v907_v29, %v888_v40  ;;  %v985_v15 = vrot.slane %v984_v49, 2  ;;  %v992_v39 = vrot.slane %v991_v1, 2 }
 0x29f   :  { %v999_v17 = vrot.slane %v998_v35, 2  ;;  %v2679_v59 = vmul.f32 %v907_v29, %v903_v37  ;;  %v1005_v23 = vadd.f32 %v1004_v51, %v1003_v2  ;;  %v1017_v60 = vsel %vm32_vm0, %v923_v16, 0.0 }
 0x2a0   :  { %v1100_v25 = vand.u32 4294901760, %v1083_v47  ;;  %v986_v52 = vadd.f32 %v985_v15, %v984_v49  ;;  %v993_v8 = vadd.f32 %v992_v39, %v991_v1  ;;  %v1012_v46 = vadd.f32 %v1011_v54, %v1010_v32 }
 0x2a1   :  { %v1000_v43 = vadd.f32 %v999_v17, %v998_v35  ;;  %v1006_v33 = vrot.slane %v1005_v23, 2  ;;  %v952_v24 = vrot.slane %v2516_v63, 1  ;;  %v957_v31 = vrot.slane %v2510_v13, 2 }
 0x2a2   :  { %1101 = vmatpush.msrb.mxu2 %v1100_v25  ;;  %v1135_v3 = vsub.f32 %v1083_v47, %v1100_v25  ;;  %1194 = vmatpush.msra.mxu1 %v1100_v25  ;;  %v987_v53 = vrot.slane %v986_v52, 1  ;;  %v1018_v22 = vrot.slane %v1017_v60, 4  ;;  %v946_v29 = vadd.f32 %v945_v20, %v2508_v55 }
 0x2a3   :  { %v963_v12 = vadd.f32 %v962_v34, %v2497_v19  ;;  %v994_v4 = vrot.slane %v993_v8, 1  ;;  %v1001_v14 = vrot.slane %v1000_v43, 1  ;;  %v958_v44 = vadd.f32 %v957_v31, %v2510_v13 }
 0x2a4   :  { %v1136_v27 = vand.u32 4294901760, %v1135_v3  ;;  %1166 = vmatpush.msra.mxu0 %v1135_v3  ;;  %v1007_v0 = vadd.f32 %v1006_v33, %v1005_v23  ;;  %v953_v45 = vadd.f32 %v952_v24, %v2516_v63  ;;  %v968_v9 = vsel %vm32_vm0, %v2502_v26, 0.0 }
 0x2a5   :  { %v964_v30 = vrot.slane %v963_v12, 2  ;;  %v959_v36 = vrot.slane %v958_v44, 1  ;;  %v969_v55 = vrot.slane %v968_v9, 4  ;;  %v975_v20 = vsel %vm32_vm0, %v2504_v57, 0.0 }
 0x2a6   :  { %v1137_v41 = vsub.f32 %v1135_v3, %v1136_v27  ;;  %1226 = vmatpush.msra.mxu2 %v1136_v27  ;;  %v976_v34 = vrot.slane %v975_v20, 4  ;;  %vm1057_vm10 = vcmask 1041409   ;;  %vm1059_vm11 = vcmask 1042434  }
 0x2a7   :  { %v965_v19 = vadd.f32 %v964_v30, %v963_v12  ;;  %v960_v42 = vadd.f32 %v959_v36, %v958_v44  ;;  %v970_v18 = vadd.f32 %v969_v55, %v968_v9  ;;  %v1058_v63 = vsel %vm1057_vm10, %v939_v6, %v2522_v48 }
 0x2a8   :  { %v1138_v13 = vand.u32 4294901760, %v1137_v41  ;;  %v977_v40 = vadd.f32 %v976_v34, %v975_v20  ;;  %v1060_v26 = vsel %vm1059_vm11, %v946_v29, %v1058_v63  ;;  %vm1061_vm12 = vcmask 1043459  }
 0x2a9   :  { %v966_v56 = vrot.slane %v965_v19, 1  ;;  %v988_v61 = vadd.f32 %v987_v53, %v986_v52  ;;  %v971_v5 = vrot.slane %v970_v18, 2  ;;  %v1062_v57 = vsel %vm1061_vm12, %v953_v45, %v1060_v26  ;;  %v1854_v26 = vld [vmem:[#allocation2 + $0x9] ss:$0 sm:$0xff] }
 0x2aa   :  { %1139 = vmatpush.msrb.mxu3 %v1138_v13  ;;  %vm1063_vm13 = vcmask 1044484   ;;  %v995_v50 = vadd.f32 %v994_v4, %v993_v8  ;;  %v978_v7 = vrot.slane %v977_v40, 2  ;;  %vm1065_vm14 = vcmask 1045509  }
 0x2ab   :  { %v1064_v38 = vsel %vm1063_vm13, %v960_v42, %v1062_v57  ;;  %v967_v21 = vadd.f32 %v966_v56, %v965_v19  ;;  %v972_v11 = vadd.f32 %v971_v5, %v970_v18  ;;  %vm1067_vm15 = vcmask 1046534  }
 0x2ac   :  { %1252 = vmatpush.msra.mxu3 %v1100_v25  ;;  %v1002_v48 = vadd.f32 %v1001_v14, %v1000_v43  ;;  %v979_v58 = vadd.f32 %v978_v7, %v977_v40  ;;  %v1008_v28 = vrot.slane %v1007_v0, 1  ;;  %v1013_v16 = vrot.slane %v1012_v46, 2 }
 0x2ad   :  { %v1019_v2 = vadd.f32 %v1018_v22, %v1017_v60  ;;  %v973_v32 = vrot.slane %v972_v11, 1  ;;  %v1066_v37 = vsel %vm1065_vm14, %v967_v21, %v1064_v38  ;;  %v1024_v49 = vsel %vm32_vm0, %v2677_v62, 0.0 }
 0x2ae   :  { %v1031_v1 = vsel %vm32_vm0, %v2679_v59, 0.0  ;;  %v980_v35 = vrot.slane %v979_v58, 1  ;;  %v1014_v6 = vadd.f32 %v1013_v16, %v1012_v46  ;;  %v1025_v54 = vrot.slane %v1024_v49, 4 }
 0x2af   :  { %v1020_v51 = vrot.slane %v1019_v2, 2  ;;  %v974_v47 = vadd.f32 %v973_v32, %v972_v11  ;;  %vm1069_vm1 = vcmask 1047559   ;;  %v1032_v15 = vrot.slane %v1031_v1, 4 }
 0x2b0   :  { %v1071_v39 = vsel %vm1057_vm10, %v995_v50, %v988_v61  ;;  %v981_v17 = vadd.f32 %v980_v35, %v979_v58  ;;  %v1015_v23 = vrot.slane %v1014_v6, 1  ;;  %v1026_v25 = vadd.f32 %v1025_v54, %v1024_v49  ;;  %v1941_v35 = vld [vmem:[%s2770_s0] sm:$0xff] }
 0x2b1   :  { %v1021_v60 = vadd.f32 %v1020_v51, %v1019_v2  ;;  %v1068_v52 = vsel %vm1067_vm15, %v974_v47, %v1066_v37  ;;  %v1009_v8 = vadd.f32 %v1008_v28, %v1007_v0  ;;  %v1033_v62 = vadd.f32 %v1032_v15, %v1031_v1 }
 0x2b2   :  { %v1072_v43 = vsel %vm1059_vm11, %v1002_v48, %v1071_v39  ;;  %v1070_v59 = vsel %vm1069_vm1, %v981_v17, %v1068_v52  ;;  %v1016_v46 = vadd.f32 %v1015_v23, %v1014_v6  ;;  %v1027_v3 = vrot.slane %v1026_v25, 2 }
 0x2b3   :  { %v1022_v33 = vrot.slane %v1021_v60, 1  ;;  %v1078_v24 = vsel %vm32_vm0, %v1070_v59, 0  ;;  %v1034_v31 = vrot.slane %v1033_v62, 2  ;;  %v1073_v53 = vsel %vm1061_vm12, %v1009_v8, %v1072_v43 }
 0x2b4   :  { %v1102_v22 = vand.u32 4294901760, %v1078_v24  ;;  %v1028_v29 = vadd.f32 %v1027_v3, %v1026_v25  ;;  %v1074_v12 = vsel %vm1063_vm13, %v1016_v46, %v1073_v53 }
 0x2b5   :  { %v1023_v4 = vadd.f32 %v1022_v33, %v1021_v60  ;;  %v1035_v14 = vadd.f32 %v1034_v31, %v1033_v62  ;;  %v1942_v60 = vld [vmem:[%s2770_s0 + $0x8] sm:$0xff]  ;;  %s2001_s0 = smov [#allocation5]  }
 0x2b6   :  { %1141 = vmatmul.f32.vlgmr.msrb.gmra.mxu3 %v1102_v22  ;;  %v1103_v27 = vsub.f32 %v1078_v24, %v1102_v22  ;;  %v1029_v44 = vrot.slane %v1028_v29, 1  ;;  %s1831_s25 = sshll.u32 %s2001_s0, 4  ;;  %s1832_s25 = int_to_ptr.vmem [resolvable:$true] %s1831_s25 }
 0x2b7   :  { %v1036_v0 = vrot.slane %v1035_v14, 1  ;;  %v1075_v45 = vsel %vm1065_vm14, %v1023_v4, %v1074_v12 }
 0x2b8   :  { %1169 = vmatmul.f32.vlgmr.msra.gmra.mxu0 %v1103_v27  ;;  %v1104_v30 = vand.u32 4294901760, %v1103_v27  ;;  %v1030_v9 = vadd.f32 %v1029_v44, %v1028_v29 }
 0x2b9   :  { %v1037_v41 = vadd.f32 %v1036_v0, %v1035_v14 }
 0x2ba   :  { %1198 = vmatmul.f32.vlgmr.msra.gmra.mxu1 %v1104_v30  ;;  %v1105_v36 = vsub.f32 %v1103_v27, %v1104_v30  ;;  %v1076_v55 = vsel %vm1067_vm15, %v1030_v9, %v1075_v45 }
 0x2bb   :  { %v1077_v20 = vsel %vm1069_vm1, %v1037_v41, %v1076_v55 }
 0x2bc   :  { %v1106_v19 = vand.u32 4294901760, %v1105_v36  ;;  %v1080_v34 = vsel %vm32_vm0, %v1077_v20, 0 }
 0x2bd   :  { %v1110_v13 = vand.u32 4294901760, %v1080_v34 }
 0x2be   :  { %1107 = vmatmul.f32.vlgmr.msrb.gmra.mxu2 %v1106_v19 }
 0x2bf   :  { %1145 = vmatmul.f32.gmra.mxu3 %v1110_v13  ;;  %v1111_v42 = vsub.f32 %v1080_v34, %v1110_v13 }
 0x2c1   :  { %1174 = vmatmul.f32.gmra.mxu0 %v1111_v42  ;;  %v1112_v18 = vand.u32 4294901760, %v1111_v42 }
 0x2c3   :  { %1204 = vmatmul.f32.gmra.mxu1 %v1112_v18  ;;  %v1113_v63 = vsub.f32 %v1111_v42, %v1112_v18 }
 0x2c5   :  { %v1114_v56 = vand.u32 4294901760, %v1113_v63 }
 0x2c7   :  { %1115 = vmatmul.f32.gmra.mxu2 %v1114_v56  ;;  %1254 = vmatmul.f32.vlgmr.msra.gmra.mxu3 %v1102_v22  ;;  %v1855_v56 = vld [vmem:[#allocation2 + $0xa] ss:$0 sm:$0xff] }
 0x2cf   :  { %1228 = vmatmul.f32.vlgmr.msra.gmra.mxu2 %v1102_v22  ;;  %1258 = vmatmul.f32.gmra.mxu3 %v1110_v13  ;;  %v1316_v22 = vld [vmem:[#allocation2 + $0xc] sm:$0x7] }
 0x2d0   :  { %v1326_v29 = vsel %vm99_vm2, %v1316_v22, 0 }
 0x2d1   :  { %v1343_v12 = vand.u32 4294901760, %v1326_v29 }
 0x2d3   :  { %1344 = vmatpush.msrb.mxu0 %v1343_v12  ;;  %v1378_v4 = vsub.f32 %v1326_v29, %v1343_v12  ;;  %1437 = vmatpush.msrb.mxu3 %v1343_v12 }
 0x2d5   :  { %v1379_v27 = vand.u32 4294901760, %v1378_v4  ;;  %1409 = vmatpush.msrb.mxu2 %v1378_v4 }
 0x2d7   :  { %1232 = vmatmul.f32.gmra.mxu2 %v1110_v13  ;;  %v1380_v0 = vsub.f32 %v1378_v4, %v1379_v27  ;;  %1469 = vmatpush.msra.mxu0 %v1379_v27 }
 0x2d9   :  { %v1381_v30 = vand.u32 4294901760, %v1380_v0 }
 0x2db   :  { %1382 = vmatpush.msrb.mxu1 %v1381_v30 }
 0x2dd   :  { %1495 = vmatpush.msra.mxu1 %v1343_v12 }
 0x335   :  { %v1170_v7 = vpop.f32.mrf.mxu0 }
 0x337   :  { %v1199_v48 = vpop.f32.mrf.mxu1 }
 0x339   :  { %v1142_v40 = vpop.f32.mrf.mxu3 }
 0x33e   :  { %v1175_v37 = vpop.f32.mrf.mxu0 }
 0x340   :  { %v1205_v51 = vpop.f32.mrf.mxu1 }
 0x341   :  { %v1108_v61 = vpop.f32.mrf.mxu2 }
 0x342   :  { %v1109_v5 = vadd.f32 %v1854_v26, %v1108_v61  ;;  %v1146_v57 = vpop.f32.mrf.mxu3 }
 0x344   :  { %v1143_v50 = vadd.f32 %v1142_v40, %v1109_v5  ;;  %v1856_v5 = vld [vmem:[#allocation2 + $0xb] ss:$0 sm:$0xff] }
 0x346   :  { %v1171_v11 = vadd.f32 %v1170_v7, %v1143_v50 }
 0x348   :  { %v1200_v28 = vadd.f32 %v1199_v48, %v1171_v11 }
 0x34a   :  { %v1116_v38 = vpop.f32.mrf.mxu2  ;;  %v1255_v16 = vpop.f32.mrf.mxu3 }
 0x34b   :  { %v1117_v21 = vadd.f32 %v1854_v26, %v1116_v38 }
 0x34d   :  { %v1147_v58 = vadd.f32 %v1146_v57, %v1117_v21 }
 0x34f   :  { %v1176_v1 = vadd.f32 %v1175_v37, %v1147_v58 }
 0x351   :  { %v1206_v54 = vadd.f32 %v1205_v51, %v1176_v1 }
 0x352   :  { %v1229_v2 = vpop.f32.mrf.mxu2  ;;  %v1259_v17 = vpop.f32.mrf.mxu3 }
 0x353   :  { %v1230_v32 = vadd.f32 %v1229_v2, %v1200_v28 }
 0x355   :  { %v1256_v49 = vadd.f32 %v1255_v16, %v1230_v32 }
 0x357   :  { %v2720_v6 = vadd.f32 %v1941_v35, %v1256_v49 }
 0x359   :  { %v1266_v47 = vsel %vm32_vm0, %v2720_v6, 0.0 }
 0x35a   :  { %v1233_v15 = vpop.f32.mrf.mxu2  ;;  %1267 = vadd.xlane.f32.xlu2 %v1266_v47 }
 0x35b   :  { %v1234_v39 = vadd.f32 %v1233_v15, %v1206_v54 }
 0x35d   :  { %v1260_v23 = vadd.f32 %v1259_v17, %v1234_v39  ;;  %v1857_v17 = vld [vmem:[#allocation2 + $0xf] ss:$0 sm:$0xff] }
 0x35f   :  { %v2727_v25 = vadd.f32 %v1942_v60, %v1260_v23 }
 0x361   :  { %v1269_v52 = vsel %vm32_vm0, %v2727_v25, 0.0 }
 0x362   :  { %1270 = vadd.xlane.f32.xlu0 %v1269_v52 }
 0x3cd   :  { %v1268_v8 = vpop.xlane.xlu2 %1267 }
 0x3ce   :  { %v1272_v62 = vmul.f32 %v1268_v8, %v2028_v10 }
 0x3d0   :  { %v1274_v43 = vsub.f32 %v2720_v6, %v1272_v62 }
 0x3d2   :  { %v1276_v59 = vmul.f32 %v1274_v43, %v1274_v43 }
 0x3d4   :  { %v1278_v46 = vsel %vm32_vm0, %v1276_v59, 0.0 }
 0x3d5   :  { %1279 = vadd.xlane.f32.xlu1 %v1278_v46  ;;  %v1271_v33 = vpop.xlane.xlu0 %1270 }
 0x3d6   :  { %v1273_v3 = vmul.f32 %v1271_v33, %v2028_v10 }
 0x3d8   :  { %v1275_v24 = vsub.f32 %v2727_v25, %v1273_v3 }
 0x3da   :  { %v1277_v31 = vmul.f32 %v1275_v24, %v1275_v24 }
 0x3dc   :  { %v1281_v53 = vsel %vm32_vm0, %v1277_v31, 0.0 }
 0x3dd   :  { %1282 = vadd.xlane.f32.xlu2 %v1281_v53 }
 0x448   :  { %v1280_v14 = vpop.xlane.xlu1 %1279 }
 0x449   :  { %v1284_v44 = vmul.f32 %v1280_v14, %v2028_v10 }
 0x44b   :  { %v1286_v45 = vadd.f32 1e-05, %v1284_v44 }
 0x44d   :  { %1929 = vrsqrt.f32 %v1286_v45  ;;  %vm1294_vm3 = vweird.f32 %v1286_v45 }
 0x450   :  { %v1283_v9 = vpop.xlane.xlu2 %1282 }
 0x451   :  { %v1285_v41 = vmul.f32 %v1283_v9, %v2028_v10 }
 0x453   :  { %v1930_v36 = vpop.eup %1929  ;;  %v1287_v55 = vadd.f32 1e-05, %v1285_v41 }
 0x454   :  { %v1289_v20 = vmul.f32 %v1930_v36, %v1286_v45  ;;  %vm1295_vm2 = vweird.f32 %v1930_v36 }
 0x455   :  { %1931 = vrsqrt.f32 %v1287_v55  ;;  %vm1296_vm4 = vmor %vm1294_vm3, %vm1295_vm2  ;;  %vm1304_vm6 = vweird.f32 %v1287_v55  ;;  %vm1589_vm2 = vcmask 97280  }
 0x456   :  { %v1290_v19 = vmul.f32 %v1930_v36, %v1289_v20 }
 0x458   :  { %v1291_v34 = vmul.f32 0.5, %v1290_v19 }
 0x45a   :  { %v1292_v13 = vsub.f32 1.5, %v1291_v34 }
 0x45b   :  { %v1932_v42 = vpop.eup %1931 }
 0x45c   :  { %v1293_v18 = vmul.f32 %v1930_v36, %v1292_v13  ;;  %v1299_v63 = vmul.f32 %v1932_v42, %v1287_v55  ;;  %vm1305_vm5 = vweird.f32 %v1932_v42 }
 0x45d   :  { %vm1306_vm7 = vmor %vm1304_vm6, %vm1305_vm5 }
 0x45e   :  { %v1297_v40 = vsel %vm1296_vm4, %v1930_v36, %v1293_v18  ;;  %v1300_v26 = vmul.f32 %v1932_v42, %v1299_v63  ;;  %vm1824_vm4 = vcmask 124928  }
 0x45f   :  { %v1308_v61 = vmul.f32 %v1297_v40, %v1274_v43 }
 0x460   :  { %v1301_v57 = vmul.f32 0.5, %v1300_v26 }
 0x461   :  { %v1311_v10 = vmul.f32 %v1855_v56, %v1308_v61 }
 0x462   :  { %v1302_v50 = vsub.f32 1.5, %v1301_v57 }
 0x463   :  { %v1314_v7 = vadd.f32 %v1856_v5, %v1311_v10  ;;  %v1585_v10 = vld [vmem:[#allocation2 + $0x10] sm:$0xff] }
 0x464   :  { %v1303_v38 = vmul.f32 %v1932_v42, %v1302_v50 }
 0x465   :  { %v1320_v21 = vsel %vm32_vm0, %v1314_v7, 0  ;;  %v1616_v7 = vand.u32 4294901760, %v1585_v10 }
 0x466   :  { %v1307_v11 = vsel %vm1306_vm7, %v1932_v42, %v1303_v38  ;;  %v1345_v48 = vand.u32 4294901760, %v1320_v21 }
 0x467   :  { %v1309_v58 = vmul.f32 %v1307_v11, %v1275_v24 }
 0x468   :  { %1384 = vmatmul.f32.vlgmr.msrb.gmra.mxu1 %v1345_v48  ;;  %v1346_v28 = vsub.f32 %v1320_v21, %v1345_v48 }
 0x469   :  { %v1312_v16 = vmul.f32 %v1855_v56, %v1309_v58  ;;  %v1586_v56 = vld [vmem:[#allocation2 + $0x18] sm:$0xf] }
 0x46a   :  { %1412 = vmatmul.f32.vlgmr.msrb.gmra.mxu2 %v1346_v28  ;;  %v1347_v2 = vand.u32 4294901760, %v1346_v28 }
 0x46b   :  { %v1315_v32 = vadd.f32 %v1856_v5, %v1312_v16 }
 0x46c   :  { %1441 = vmatmul.f32.vlgmr.msrb.gmra.mxu3 %v1347_v2  ;;  %v1348_v37 = vsub.f32 %v1346_v28, %v1347_v2  ;;  %v1656_v28 = vsub.f32 %v1585_v10, %v1616_v7 }
 0x46d   :  { %v1323_v49 = vsel %vm32_vm0, %v1315_v32, 0  ;;  %vm1596_vm0 = vcmask 1043456  }
 0x46e   :  { %v1349_v1 = vand.u32 4294901760, %v1348_v37  ;;  %v1353_v35 = vand.u32 4294901760, %v1323_v49  ;;  %v1598_v5 = vsel %vm1596_vm0, %v1586_v56, 0 }
 0x46f   :  { %v1614_v57 = vand.u32 4294901760, %v1598_v5 }
 0x470   :  { %1350 = vmatmul.f32.vlgmr.msrb.gmra.mxu0 %v1349_v1  ;;  %1388 = vmatmul.f32.gmra.mxu1 %v1353_v35  ;;  %v1354_v51 = vsub.f32 %v1323_v49, %v1353_v35  ;;  %v1657_v49 = vand.u32 4294901760, %v1656_v28 }
 0x471   :  { %1615 = vmatpush.msra.mxu2 %v1614_v57  ;;  %v1650_v21 = vsub.f32 %v1598_v5, %v1614_v57  ;;  %1716 = vmatpush.msrb.mxu1 %v1614_v57 }
 0x472   :  { %1417 = vmatmul.f32.gmra.mxu2 %v1354_v51  ;;  %v1355_v54 = vand.u32 4294901760, %v1354_v51 }
 0x473   :  { %v1651_v32 = vand.u32 4294901760, %v1650_v21  ;;  %1686 = vmatpush.msrb.mxu0 %v1650_v21  ;;  %1617 = vmatpush.msra.mxu2 %v1616_v7 }
 0x474   :  { %1447 = vmatmul.f32.gmra.mxu3 %v1355_v54  ;;  %v1356_v47 = vsub.f32 %v1354_v51, %v1355_v54  ;;  %1718 = vmatpush.msrb.mxu1 %v1616_v7 }
 0x475   :  { %1689 = vmatpush.msrb.mxu0 %v1656_v28  ;;  %1749 = vmatpush.msrb.mxu2 %v1651_v32 }
 0x476   :  { %v1357_v15 = vand.u32 4294901760, %v1356_v47 }
 0x477   :  { %1753 = vmatpush.msrb.mxu2 %v1657_v49 }
 0x478   :  { %1358 = vmatmul.f32.gmra.mxu0 %v1357_v15  ;;  %1497 = vmatmul.f32.vlgmr.msra.gmra.mxu1 %v1345_v48  ;;  %v1658_v15 = vsub.f32 %v1656_v28, %v1657_v49 }
 0x480   :  { %1471 = vmatmul.f32.vlgmr.msra.gmra.mxu0 %v1345_v48  ;;  %1501 = vmatmul.f32.gmra.mxu1 %v1353_v35 }
 0x488   :  { %1475 = vmatmul.f32.gmra.mxu0 %v1353_v35  ;;  %v1652_v35 = vsub.f32 %v1650_v21, %v1651_v32 }
 0x4e5   :  { %v1385_v39 = vpop.f32.mrf.mxu1 }
 0x4ed   :  { %v1351_v23 = vpop.f32.mrf.mxu0  ;;  %v1389_v52 = vpop.f32.mrf.mxu1 }
 0x4ee   :  { %v1352_v60 = vadd.f32 %v1857_v17, %v1351_v23  ;;  %v1413_v62 = vpop.f32.mrf.mxu2  ;;  %v1653_v23 = vand.u32 4294901760, %v1652_v35  ;;  %v1858_v35 = vld [vmem:[#allocation2 + $0x1c] ss:$0 sm:$0xff] }
 0x4ef   :  { %v1442_v33 = vpop.f32.mrf.mxu3 }
 0x4f0   :  { %v1386_v8 = vadd.f32 %v1385_v39, %v1352_v60  ;;  %1654 = vmatpush.msra.mxu3 %v1653_v23 }
 0x4f2   :  { %v1414_v59 = vadd.f32 %v1413_v62, %v1386_v8 }
 0x4f4   :  { %v1443_v3 = vadd.f32 %v1442_v33, %v1414_v59 }
 0x4f5   :  { %v1359_v43 = vpop.f32.mrf.mxu0  ;;  %v1498_v31 = vpop.f32.mrf.mxu1 }
 0x4f6   :  { %v1360_v46 = vadd.f32 %v1857_v17, %v1359_v43  ;;  %v1418_v29 = vpop.f32.mrf.mxu2 }
 0x4f7   :  { %v1448_v27 = vpop.f32.mrf.mxu3 }
 0x4f8   :  { %v1390_v24 = vadd.f32 %v1389_v52, %v1360_v46  ;;  %v1659_v52 = vand.u32 4294901760, %v1658_v15 }
 0x4fa   :  { %v1419_v12 = vadd.f32 %v1418_v29, %v1390_v24  ;;  %1660 = vmatpush.msra.mxu3 %v1659_v52 }
 0x4fc   :  { %v1449_v44 = vadd.f32 %v1448_v27, %v1419_v12  ;;  %1778 = vmatpush.msrb.mxu3 %v1614_v57 }
 0x4fd   :  { %v1472_v53 = vpop.f32.mrf.mxu0  ;;  %v1502_v41 = vpop.f32.mrf.mxu1 }
 0x4fe   :  { %v1473_v22 = vadd.f32 %v1472_v53, %v1443_v3  ;;  %1780 = vmatpush.msrb.mxu3 %v1616_v7 }
 0x500   :  { %v2742_v4 = vadd.f32 %v1498_v31, %v1473_v22 }
 0x502   :  { %v2745_v14 = vmul.f32 0.70710677, %v2742_v4 }
 0x504   :  { %v1509_v0 = vand.u32 2147483647, %v2745_v14  ;;  %vm1575_vm1 = vcmp.ge.f32.partialorder %v2745_v14, 0.0 }
 0x505   :  { %v1476_v45 = vpop.f32.mrf.mxu0 }
 0x506   :  { %v1511_v30 = vmul.f32 0.3275911, %v1509_v0  ;;  %v1477_v9 = vadd.f32 %v1476_v45, %v1449_v44  ;;  %v1563_v58 = vsub.f32 0.0, %v1509_v0 }
 0x508   :  { %v1513_v36 = vadd.f32 1.0, %v1511_v30  ;;  %v2748_v55 = vadd.f32 %v1502_v41, %v1477_v9  ;;  %v1565_v54 = vmul.f32 %v1563_v58, %v1509_v0 }
 0x50a   :  { %1933 = vrcp.f32 %v1513_v36  ;;  %v2751_v20 = vmul.f32 0.70710677, %v2748_v55  ;;  %v1526_v40 = vand.u32 2147483648, %v1513_v36  ;;  %v1524_v61 = vand.u32 2147483647, %v1513_v36 }
 0x50b   :  { %vm1520_vm9 = vweird.f32 %v1513_v36  ;;  %v1567_v59 = vmul.f32 1.442695, %v1565_v54 }
 0x50c   :  { %v2754_v19 = vand.u32 2147483647, %v2751_v20  ;;  %v1527_v38 = vor.u32 1.1754944e-38, %v1526_v40  ;;  %vm1525_vm11 = vcmp.eq.f32.partialorder %v1524_v61, 8.507059e+37  ;;  %v1505_v40 = vmul.f32 0.5, %v2742_v4 }
 0x50d   :  { %vm1576_vm3 = vcmp.ge.f32.partialorder %v2751_v20, 0.0 }
 0x50e   :  { %v1512_v34 = vmul.f32 0.3275911, %v2754_v19  ;;  %v1564_v24 = vsub.f32 0.0, %v2754_v19 }
 0x510   :  { %v1934_v13 = vpop.eup %1933  ;;  %v1514_v18 = vadd.f32 1.0, %v1512_v34  ;;  %v1566_v12 = vmul.f32 %v1564_v24, %v2754_v19 }
 0x511   :  { %v1516_v42 = vmul.f32 %v1934_v13, %v1513_v36  ;;  %vm1521_vm8 = vweird.f32 %v1934_v13 }
 0x512   :  { %1935 = vrcp.f32 %v1514_v18  ;;  %vm1522_vm10 = vmor %vm1520_vm9, %vm1521_vm8  ;;  %v1541_v47 = vand.u32 2147483648, %v1514_v18  ;;  %v1539_v17 = vand.u32 2147483647, %v1514_v18  ;;  %vm1535_vm13 = vweird.f32 %v1514_v18 }
 0x513   :  { %v1517_v63 = vsub.f32 1.0, %v1516_v42  ;;  %1937 = vpow2.f32 %v1567_v59  ;;  %v1569_v30 = vmul.f32 1.442695, %v1566_v12 }
 0x514   :  { %v1542_v43 = vor.u32 1.1754944e-38, %v1541_v47  ;;  %vm1540_vm15 = vcmp.eq.f32.partialorder %v1539_v17, 8.507059e+37 }
 0x515   :  { %v1518_v26 = vmul.f32 %v1934_v13, %v1517_v63  ;;  %1939 = vpow2.f32 %v1569_v30 }
 0x517   :  { %v1519_v50 = vadd.f32 %v1934_v13, %v1518_v26 }
 0x518   :  { %v1936_v11 = vpop.eup %1935 }
 0x519   :  { %v1523_v48 = vsel %vm1522_vm10, %v1934_v13, %v1519_v50  ;;  %v1531_v2 = vmul.f32 %v1936_v11, %v1514_v18  ;;  %vm1536_vm12 = vweird.f32 %v1936_v11  ;;  %v1938_v9 = vpop.eup %1937 }
 0x51a   :  { %v1528_v16 = vsel %vm1525_vm11, %v1527_v38, %v1523_v48  ;;  %vm1537_vm14 = vmor %vm1535_vm13, %vm1536_vm12 }
 0x51b   :  { %v1545_v37 = vmul.f32 1.0614054, %v1528_v16  ;;  %v1532_v1 = vsub.f32 1.0, %v1531_v2  ;;  %v1940_v61 = vpop.eup %1939 }
 0x51d   :  { %v1547_v51 = vadd.f32 -1.4531521, %v1545_v37  ;;  %v1533_v39 = vmul.f32 %v1936_v11, %v1532_v1 }
 0x51f   :  { %v1549_v60 = vmul.f32 %v1547_v51, %v1528_v16  ;;  %v1534_v8 = vadd.f32 %v1936_v11, %v1533_v39 }
 0x521   :  { %v1551_v62 = vadd.f32 1.4214138, %v1549_v60  ;;  %v1538_v46 = vsel %vm1537_vm14, %v1936_v11, %v1534_v8  ;;  %v1506_v11 = vmul.f32 0.5, %v2748_v55 }
 0x522   :  { %v1543_v3 = vsel %vm1540_vm15, %v1542_v43, %v1538_v46 }
 0x523   :  { %v1553_v33 = vmul.f32 %v1551_v62, %v1528_v16  ;;  %v1546_v31 = vmul.f32 1.0614054, %v1543_v3 }
 0x525   :  { %v1555_v53 = vadd.f32 -0.28449672, %v1553_v33  ;;  %v1548_v22 = vadd.f32 -1.4531521, %v1546_v31 }
 0x527   :  { %v1557_v29 = vmul.f32 %v1555_v53, %v1528_v16  ;;  %v1550_v27 = vmul.f32 %v1548_v22, %v1543_v3 }
 0x529   :  { %v1559_v44 = vadd.f32 0.2548296, %v1557_v29  ;;  %v1552_v0 = vadd.f32 1.4214138, %v1550_v27 }
 0x52b   :  { %v1561_v45 = vmul.f32 %v1559_v44, %v1528_v16  ;;  %v1554_v41 = vmul.f32 %v1552_v0, %v1543_v3 }
 0x52d   :  { %v1571_v36 = vmul.f32 %v1938_v9, %v1561_v45  ;;  %v1556_v34 = vadd.f32 -0.28449672, %v1554_v41 }
 0x52f   :  { %v1573_v13 = vsub.f32 1.0, %v1571_v36  ;;  %v1558_v42 = vmul.f32 %v1556_v34, %v1543_v3 }
 0x531   :  { %v1577_v18 = vsub.f32 0.0, %v1573_v13  ;;  %v1560_v63 = vadd.f32 0.2548296, %v1558_v42 }
 0x533   :  { %v1579_v56 = vsel %vm1575_vm1, %v1573_v13, %v1577_v18  ;;  %v1562_v26 = vmul.f32 %v1560_v63, %v1543_v3 }
 0x534   :  { %v1581_v19 = vadd.f32 1.0, %v1579_v56 }
 0x535   :  { %v1572_v57 = vmul.f32 %v1940_v61, %v1562_v26 }
 0x536   :  { %v1583_v5 = vmul.f32 %v1581_v19, %v1505_v40 }
 0x537   :  { %v1574_v10 = vsub.f32 1.0, %v1572_v57 }
 0x538   :  { %v1591_v50 = vsel %vm1589_vm2, %v1583_v5, 0 }
 0x539   :  { %v1618_v7 = vand.u32 4294901760, %v1591_v50  ;;  %v1578_v38 = vsub.f32 0.0, %v1574_v10 }
 0x53b   :  { %1662 = vmatmul.f32.vlgmr.msra.gmra.mxu3 %v1618_v7  ;;  %v1619_v21 = vsub.f32 %v1591_v50, %v1618_v7  ;;  %v1580_v14 = vsel %vm1576_vm3, %v1574_v10, %v1578_v38 }
 0x53c   :  { %v1582_v48 = vadd.f32 1.0, %v1580_v14 }
 0x53d   :  { %1692 = vmatmul.f32.vlgmr.msrb.gmra.mxu0 %v1619_v21  ;;  %v1620_v4 = vand.u32 4294901760, %v1619_v21 }
 0x53e   :  { %v1584_v58 = vmul.f32 %v1582_v48, %v1506_v11 }
 0x53f   :  { %1722 = vmatmul.f32.vlgmr.msrb.gmra.mxu1 %v1620_v4  ;;  %v1621_v28 = vsub.f32 %v1619_v21, %v1620_v4 }
 0x540   :  { %v1594_v2 = vsel %vm1589_vm2, %v1584_v58, 0 }
 0x541   :  { %v1622_v16 = vand.u32 4294901760, %v1621_v28  ;;  %v1626_v32 = vand.u32 4294901760, %v1594_v2 }
 0x543   :  { %1623 = vmatmul.f32.vlgmr.msra.gmra.mxu2 %v1622_v16  ;;  %1666 = vmatmul.f32.gmra.mxu3 %v1626_v32  ;;  %v1627_v37 = vsub.f32 %v1594_v2, %v1626_v32 }
 0x545   :  { %1697 = vmatmul.f32.gmra.mxu0 %v1627_v37  ;;  %v1628_v20 = vand.u32 4294901760, %v1627_v37 }
 0x547   :  { %1728 = vmatmul.f32.gmra.mxu1 %v1628_v20  ;;  %v1629_v49 = vsub.f32 %v1627_v37, %v1628_v20 }
 0x549   :  { %v1630_v1 = vand.u32 4294901760, %v1629_v49 }
 0x54b   :  { %1631 = vmatmul.f32.gmra.mxu2 %v1630_v1  ;;  %1782 = vmatmul.f32.vlgmr.msrb.gmra.mxu3 %v1618_v7 }
 0x553   :  { %1755 = vmatmul.f32.vlgmr.msrb.gmra.mxu2 %v1618_v7  ;;  %1786 = vmatmul.f32.gmra.mxu3 %v1626_v32 }
 0x55b   :  { %1759 = vmatmul.f32.gmra.mxu2 %v1626_v32 }
 0x5ba   :  { %v1693_v39 = vpop.f32.mrf.mxu0 }
 0x5bc   :  { %v1723_v52 = vpop.f32.mrf.mxu1 }
 0x5be   :  { %v1663_v55 = vpop.f32.mrf.mxu3 }
 0x5c2   :  { %v1698_v33 = vpop.f32.mrf.mxu0 }
 0x5c4   :  { %v1729_v53 = vpop.f32.mrf.mxu1 }
 0x5c6   :  { %v1624_v51 = vpop.f32.mrf.mxu2  ;;  %v1667_v47 = vpop.f32.mrf.mxu3 }
 0x5c7   :  { %v1625_v54 = vadd.f32 %v1858_v35, %v1624_v51 }
 0x5c9   :  { %v1664_v15 = vadd.f32 %v1663_v55, %v1625_v54 }
 0x5cb   :  { %v1694_v60 = vadd.f32 %v1693_v39, %v1664_v15 }
 0x5cd   :  { %v1724_v62 = vadd.f32 %v1723_v52, %v1694_v60 }
 0x5ce   :  { %v1632_v17 = vpop.f32.mrf.mxu2  ;;  %v1783_v43 = vpop.f32.mrf.mxu3 }
 0x5cf   :  { %v1633_v23 = vadd.f32 %v1858_v35, %v1632_v17 }
 0x5d1   :  { %v1668_v8 = vadd.f32 %v1667_v47, %v1633_v23 }
 0x5d3   :  { %v1699_v24 = vadd.f32 %v1698_v33, %v1668_v8 }
 0x5d5   :  { %v1730_v22 = vadd.f32 %v1729_v53, %v1699_v24 }
 0x5d6   :  { %v1756_v59 = vpop.f32.mrf.mxu2  ;;  %v1787_v27 = vpop.f32.mrf.mxu3 }
 0x5d7   :  { %v1757_v46 = vadd.f32 %v1756_v59, %v1724_v62 }
 0x5d9   :  { %v1784_v3 = vadd.f32 %v1783_v43, %v1757_v46 }
 0x5db   :  { %v1790_v31 = vadd.f32 %v1784_v3, %v2720_v6 }
 0x5dd   :  { %1792 = vxpose.xlu2.b32.start [1/2] (short) (narrow) %v1790_v31, 8 }
 0x5de   :  { %v1760_v29 = vpop.f32.mrf.mxu2 }
 0x5df   :  { %v1761_v12 = vadd.f32 %v1760_v29, %v1730_v22 }
 0x5e1   :  { %v1788_v44 = vadd.f32 %v1787_v27, %v1761_v12 }
 0x5e3   :  { %v1791_v0 = vadd.f32 %v1788_v44, %v2727_v25 }
 0x5e5   :  { %1793 = vxpose.xlu2.b32.end [2/2] (short) (narrow) %v1791_v0, 8 }
 0x676   :  { %v1808_v6 = vpop.trf.xlu2 }
 0x677   :  { %1825 = vst.msk [vmem:[#allocation5] sm:$0x7] %vm1824_vm4, %v1808_v6 }
 0x678   :  { %1836 = dma.vmem_to_hbm [thread:$0]  %s1832_s25, 64, %s1834_s28, [#allocation4]  }
 0x679   :  { %1993 = dma.done.wait [#allocation4], 64  }
 0x67a   :  { %1994 = vsyncadd [#allocation4], 4294967232 }
 0x67b   :  { %1841 = vsyncpa [#allocation3], 1 }
 0x67c   :  { %1842 = vsyncpa [#allocation4], 1 }

</bundles_post_ra>
